<compile_context>
chip_gen: v6e
topology: v6e:2x2x1
jax: 0.10.0
libtpu: 0.0.40
codegen_flags: <defaults>
</compile_context>

<pallas_src>
import functools

import jax
import jax.numpy as jnp
from jax import lax
from jax.experimental import pallas as pl
from jax.experimental.pallas import tpu as pltpu


# ------------------------------ planning helpers -------------------------------


def _vmem_budget_bytes():
    """Per-generation usable VMEM budget (capacity minus headroom)."""
    cap = 64 * 2**20  # conservative default (v7x per-core VMEM)
    try:
        info = pltpu.get_tpu_info()
        cap = int(getattr(info, "vmem_capacity_bytes", cap) or cap)
    except Exception:
        pass
    return max(cap - 24 * 2**20, cap // 2)


def _plan_time_chunks(T, B_blk, d_max, H, O, budget):
    """Pick the largest time chunk whose double-buffered blocks fit the budget."""
    b_pad = max(8, -(-B_blk // 8) * 8)
    g4 = 4 * H
    per_t = (2 * B_blk * d_max * 2        # x blocks (bf16, double-buffered)
             + 2 * B_blk * H * 2          # hidden-out blocks (bf16, double-buffered)
             + b_pad * g4 * 4)            # in-kernel gate scratch (f32)
    fixed = (2 * d_max * g4 * 2           # W_ih (bf16, 2 buffers)
             + 2 * H * g4 * 2             # W_hh
             + 2 * g4 * 4                 # bias
             + 2 * (H * O + O) * 4        # fc head
             + 2 * b_pad * H * 4)         # h/c state scratch
    avail = max(budget - fixed, per_t)
    t_max = int(max(1, min(512, T, avail // per_t)))
    t_div = max(d for d in range(1, t_max + 1) if T % d == 0)
    # Prefer a divisor of T (no padding) unless it wastes >2x of the legal chunk.
    t_chunk = t_div if (t_div * 2 >= t_max or t_div == T) else t_max
    t_pad = -(-T // t_chunk) * t_chunk
    return t_chunk, t_pad


# ------------------------------- Pallas kernel ---------------------------------


def _lstm_gate_step(z, c_prev, H):
    """PyTorch gate order [i | f | g | o]; gate math and state in f32."""
    if H % 128 == 0:
        i_g = jax.nn.sigmoid(z[:, 0 * H:1 * H])
        f_g = jax.nn.sigmoid(z[:, 1 * H:2 * H])
        g_g = jnp.tanh(z[:, 2 * H:3 * H])
        o_g = jax.nn.sigmoid(z[:, 3 * H:4 * H])
    else:
        # H not lane-aligned: two full-lane EUP passes, slice afterwards.
        zs = jax.nn.sigmoid(z)
        zt = jnp.tanh(z)
        i_g = zs[:, 0 * H:1 * H]
        f_g = zs[:, 1 * H:2 * H]
        g_g = zt[:, 2 * H:3 * H]
        o_g = zs[:, 3 * H:4 * H]
    c_new = f_g * c_prev + i_g * g_g
    h_new = o_g * jnp.tanh(c_new)
    return h_new, c_new


def _lstm_layer_kernel(*refs, t_chunk, t_valid, big_matmul, unroll, fused_head):
    """One LSTM layer. grid = (batch_blocks ['parallel'], time_chunks ['arbitrary']).

    Inputs: x (t_chunk, B_blk, D) bf16, W_ih (D,4H) bf16, W_hh (H,4H) bf16,
    bias (1,4H) f32 [, W_fc (H,O) f32, b_fc (1,O) f32].
    Output: hidden sequence (t_chunk, B_blk, H) bf16, or (B_blk, O) f32 when the
    fc head is fused (final layer).  Scratch: h, c [, g].
    """
    if fused_head:
        x_ref, wih_ref, whh_ref, b_ref, wfc_ref, bfc_ref, out_ref = refs[:7]
        scratch = refs[7:]
    else:
        x_ref, wih_ref, whh_ref, b_ref, out_ref = refs[:5]
        scratch = refs[5:]
    if big_matmul:
        h_sc, c_sc, g_sc = scratch
    else:
        h_sc, c_sc = scratch
        g_sc = None

    chunk = pl.program_id(1)

    @pl.when(chunk == 0)
    def _():
        h_sc[...] = jnp.zeros_like(h_sc)
        c_sc[...] = jnp.zeros_like(c_sc)

    B_blk, H = h_sc.shape
    G4 = 4 * H
    D = x_ref.shape[-1]

    # Grid-invariant operands, loaded once per grid step and hoisted out of the loop.
    wih = wih_ref[...]          # (D, 4H)  bf16
    whh = whh_ref[...]          # (H, 4H)  bf16
    bias = b_ref[...]           # (1, 4H)  f32

    if big_matmul:
        # One lane-dense MXU pass for the whole chunk's input projection
        # (B_blk is 16-aligned so the reshapes are pure re-tilings).
        x2d = x_ref[...].reshape(t_chunk * B_blk, D)
        g2d = jnp.dot(x2d, wih, preferred_element_type=jnp.float32) + bias
        g_sc[...] = g2d.reshape(t_chunk, B_blk, G4)

    def step(t, carry):
        h_prev, c_prev = carry
        hz = jnp.dot(h_prev.astype(jnp.bfloat16), whh,
                     preferred_element_type=jnp.float32)
        if big_matmul:
            z = g_sc[t] + hz
        else:
            z = (jnp.dot(x_ref[t], wih, preferred_element_type=jnp.float32)
                 + bias + hz)
        h_new, c_new = _lstm_gate_step(z, c_prev, H)
        if t_valid is not None:
            # Time was padded: freeze the state past the true sequence length.
            m = ((chunk * t_chunk + t) < t_valid).astype(jnp.float32)
            h_new = h_prev + m * (h_new - h_prev)
            c_new = c_prev + m * (c_new - c_prev)
        if not fused_head:
            out_ref[t] = h_new.astype(out_ref.dtype)
        return h_new, c_new

    h, c = lax.fori_loop(0, t_chunk, step, (h_sc[...], c_sc[...]), unroll=unroll)
    h_sc[...] = h
    c_sc[...] = c

    if fused_head:
        # fc head only on the final chunk; the (B_blk, O) block is resident across
        # the 'arbitrary' time axis, so only this value reaches HBM.
        @pl.when(chunk == pl.num_programs(1) - 1)
        def _():
            out_ref[...] = (
                jnp.dot(h, wfc_ref[...], preferred_element_type=jnp.float32)
                + bfc_ref[...]
            ).astype(out_ref.dtype)


# ------------------------------- JAX wrappers ----------------------------------


def _lstm_layer(x, w_ih, w_hh, b_ih, b_hh, *, t_chunk, t_valid, n_b, fc, budget):
    """x: (T_pad, B, D) bf16, time-major. Returns (T_pad, B, H) bf16 or (B, O) f32."""
    T_pad, B, D = x.shape
    G4 = w_ih.shape[0]
    H = G4 // 4
    B_blk = B // n_b
    n_chunks = T_pad // t_chunk
    big_matmul = (B_blk % 16 == 0)         # bf16-safe chunk-level projection path

    wih = jnp.transpose(w_ih).astype(jnp.bfloat16)           # (D, 4H)
    whh = jnp.transpose(w_hh).astype(jnp.bfloat16)           # (H, 4H)
    bias = (b_ih + b_hh).astype(jnp.float32).reshape(1, G4)

    # unroll vs. register pressure (h/c carry + gate temps under deep unroll).
    b_pad = max(8, -(-B_blk // 8) * 8)
    state_bytes = b_pad * H * 4
    unroll = 8 if state_bytes <= 16 * 1024 else (4 if state_bytes <= 64 * 1024 else 2)
    unroll = max(1, min(unroll, t_chunk))

    x_spec = pl.BlockSpec((t_chunk, B_blk, D), lambda b, c: (c, b, 0))
    wih_spec = pl.BlockSpec((D, G4), lambda b, c: (0, 0))
    whh_spec = pl.BlockSpec((H, G4), lambda b, c: (0, 0))
    b_spec = pl.BlockSpec((1, G4), lambda b, c: (0, 0))

    scratch = [pltpu.VMEM((B_blk, H), jnp.float32),           # h state
               pltpu.VMEM((B_blk, H), jnp.float32)]           # c state
    if big_matmul:
        scratch.append(pltpu.VMEM((t_chunk, B_blk, G4), jnp.float32))

    O = fc[0].shape[0] if fc is not None else 0
    est = (2 * t_chunk * B_blk * D * 2
           + 2 * t_chunk * B_blk * H * 2
           + 2 * (D * G4 + H * G4) * 2
           + 2 * G4 * 4
           + 2 * b_pad * H * 4
           + (t_chunk * b_pad * G4 * 4 if big_matmul else 0)
           + (2 * (H * O + O) * 4 if fc is not None else 0))
    vmem_limit = int(min(budget, max(4 * est, 16 * 2**20)))

    cparams = pltpu.CompilerParams(
        dimension_semantics=("parallel", "arbitrary"),
        vmem_limit_bytes=vmem_limit)

    kern = functools.partial(
        _lstm_layer_kernel, t_chunk=t_chunk, t_valid=t_valid,
        big_matmul=big_matmul, unroll=unroll, fused_head=fc is not None)

    if fc is None:
        return pl.pallas_call(
            kern,
            out_shape=jax.ShapeDtypeStruct((T_pad, B, H), jnp.bfloat16),
            grid_spec=pltpu.PrefetchScalarGridSpec(
                num_scalar_prefetch=0,
                grid=(n_b, n_chunks),
                in_specs=[x_spec, wih_spec, whh_spec, b_spec],
                out_specs=pl.BlockSpec((t_chunk, B_blk, H), lambda b, c: (c, b, 0)),
                scratch_shapes=scratch),
            compiler_params=cparams,
        )(x, wih, whh, bias)

    w_fc, b_fc = fc
    wfc = jnp.transpose(w_fc).astype(jnp.float32)             # (H, O)
    bfc = b_fc.astype(jnp.float32).reshape(1, O)
    return pl.pallas_call(
        kern,
        out_shape=jax.ShapeDtypeStruct((B, O), jnp.float32),
        grid_spec=pltpu.PrefetchScalarGridSpec(
            num_scalar_prefetch=0,
            grid=(n_b, n_chunks),
            in_specs=[x_spec, wih_spec, whh_spec, b_spec,
                      pl.BlockSpec((H, O), lambda b, c: (0, 0)),
                      pl.BlockSpec((1, O), lambda b, c: (0, 0))],
            out_specs=pl.BlockSpec((B_blk, O), lambda b, c: (b, 0)),
            scratch_shapes=scratch),
        compiler_params=cparams,
    )(x, wih, whh, bias, wfc, bfc)


@jax.jit
def lstm_forward(x, params):
    """x: (B, T, input_dim), batch_first — same interface as the PyTorch module."""
    B, T, D0 = x.shape
    layers = params["lstm"]
    H = layers[0][1].shape[1]
    O = params["fc_w"].shape[0]

    # v7x dual-TensorCore batch split (inactive for small B; harmless on 1-TC chips).
    n_b = 2 if (B % 16 == 0 and B >= 32) else 1
    B_blk = B // n_b

    budget = _vmem_budget_bytes()
    t_chunk, T_pad = _plan_time_chunks(T, B_blk, max(D0, H), H, O, budget)

    # One transpose to time-major + bf16 (MXU operand dtype) at the JAX level.
    xt = jnp.transpose(x, (1, 0, 2)).astype(jnp.bfloat16)     # (T, B, D0)
    if T_pad != T:
        xt = jnp.pad(xt, ((0, T_pad - T), (0, 0), (0, 0)))
    t_valid = T if T_pad != T else None

    out = xt
    for li, (w_ih, w_hh, b_ih, b_hh) in enumerate(layers):
        fc = (params["fc_w"], params["fc_b"]) if li == len(layers) - 1 else None
        out = _lstm_layer(out, w_ih, w_hh, b_ih, b_hh,
                          t_chunk=t_chunk, t_valid=t_valid, n_b=n_b,
                          fc=fc, budget=budget)
    return out


# --------------------------- parameter construction ---------------------------


def init_params(key, input_dim, hidden_dim, num_layers, output_dim):
    """Deterministic init matching nn.LSTM / nn.Linear shapes (uniform +-1/sqrt(H))."""
    k = 1.0 / jnp.sqrt(jnp.float32(hidden_dim))
    lstm_params = []
    for layer in range(num_layers):
        d_in = input_dim if layer == 0 else hidden_dim
        key, k1, k2, k3, k4 = jax.random.split(key, 5)
        w_ih = jax.random.uniform(k1, (4 * hidden_dim, d_in), jnp.float32, -k, k)
        w_hh = jax.random.uniform(k2, (4 * hidden_dim, hidden_dim), jnp.float32, -k, k)
        b_ih = jax.random.uniform(k3, (4 * hidden_dim,), jnp.float32, -k, k)
        b_hh = jax.random.uniform(k4, (4 * hidden_dim,), jnp.float32, -k, k)
        lstm_params.append((w_ih, w_hh, b_ih, b_hh))
    key, k5, k6 = jax.random.split(key, 3)
    fc_w = jax.random.uniform(k5, (output_dim, hidden_dim), jnp.float32, -k, k)
    fc_b = jax.random.uniform(k6, (output_dim,), jnp.float32, -k, k)
    return {"lstm": lstm_params, "fc_w": fc_w, "fc_b": fc_b}


# ------------------------------ pure-JAX references ----------------------------


def lstm_forward_ref_f32(x, params):
    """Full-f32 reference with exact nn.LSTM semantics (gate order i,f,g,o)."""
    out = x
    for (w_ih, w_hh, b_ih, b_hh) in params["lstm"]:
        B, T, _ = out.shape
        H = w_hh.shape[1]
        h = jnp.zeros((B, H), jnp.float32)
        c = jnp.zeros((B, H), jnp.float32)
        ys = []
        for t in range(T):
            z = out[:, t, :] @ w_ih.T + h @ w_hh.T + b_ih + b_hh
            i = jax.nn.sigmoid(z[:, 0 * H:1 * H])
            f = jax.nn.sigmoid(z[:, 1 * H:2 * H])
            g = jnp.tanh(z[:, 2 * H:3 * H])
            o = jax.nn.sigmoid(z[:, 3 * H:4 * H])
            c = f * c + i * g
            h = o * jnp.tanh(c)
            ys.append(h)
        out = jnp.stack(ys, axis=1)
    return out[:, -1, :] @ params["fc_w"].T + params["fc_b"]


def lstm_forward_ref_matched(x, params):
    """Reference emulating the kernels' bf16-operand / f32-accumulate MXU math
    and the bf16 inter-layer hidden sequence."""
    out = x.astype(jnp.bfloat16)
    n_layers = len(params["lstm"])
    for li, (w_ih, w_hh, b_ih, b_hh) in enumerate(params["lstm"]):
        B, T, _ = out.shape
        H = w_hh.shape[1]
        wih = jnp.transpose(w_ih).astype(jnp.bfloat16)
        whh = jnp.transpose(w_hh).astype(jnp.bfloat16)
        bias = (b_ih + b_hh).astype(jnp.float32)
        h = jnp.zeros((B, H), jnp.float32)
        c = jnp.zeros((B, H), jnp.float32)
        ys = []
        for t in range(T):
            z = (jnp.dot(out[:, t, :], wih, preferred_element_type=jnp.float32)
                 + bias
                 + jnp.dot(h.astype(jnp.bfloat16), whh,
                           preferred_element_type=jnp.float32))
            i = jax.nn.sigmoid(z[:, 0 * H:1 * H])
            f = jax.nn.sigmoid(z[:, 1 * H:2 * H])
            g = jnp.tanh(z[:, 2 * H:3 * H])
            o = jax.nn.sigmoid(z[:, 3 * H:4 * H])
            c = f * c + i * g
            h = o * jnp.tanh(c)
            ys.append(h)
        if li == n_layers - 1:
            return (jnp.dot(h, jnp.transpose(params["fc_w"]).astype(jnp.float32))
                    + params["fc_b"])
        out = jnp.stack(ys, axis=1).astype(jnp.bfloat16)


# ------------------------------------ main -------------------------------------


if __name__ == "__main__":
    batch, seq, input_dim, hidden_dim, num_layers, output_dim = 2, 8, 4, 32, 2, 1

    key = jax.random.PRNGKey(0)
    key, xk = jax.random.split(key)
    x = jax.random.normal(xk, (batch, seq, input_dim), jnp.float32)
    params = init_params(key, input_dim, hidden_dim, num_layers, output_dim)

    out = lstm_forward(x, params)
    jax.block_until_ready(out)
    assert out.shape == (batch, output_dim), out.shape

    # (1) Same-precision check (bf16 MXU operands, f32 accumulation/state).
    ref_matched = lstm_forward_ref_matched(x, params)
    assert jnp.allclose(out, ref_matched, atol=2e-3, rtol=2e-3), (out, ref_matched)

    # (2) Module-semantics check vs the full-f32 PyTorch-equivalent reference.
    ref_f32 = lstm_forward_ref_f32(x, params)
    assert jnp.allclose(out, ref_f32, atol=3e-2, rtol=3e-2), (out, ref_f32)

    print("KERNEL_OK")
</pallas_src>

<mosaic_0001>
module attributes {stable_mosaic.version = 11 : i64} {
  func.func @_lstm_layer_kernel(%arg0: i32, %arg1: i32, %arg2: memref<8x2x4xbf16, #tpu.memory_space<vmem>>, %arg3: memref<4x128xbf16, #tpu.memory_space<vmem>>, %arg4: memref<32x128xbf16, #tpu.memory_space<vmem>>, %arg5: memref<1x128xf32, #tpu.memory_space<vmem>>, %arg6: memref<8x2x32xbf16, #tpu.memory_space<vmem>>, %arg7: memref<2x32xf32, #tpu.memory_space<vmem>>, %arg8: memref<2x32xf32, #tpu.memory_space<vmem>>) attributes {dimension_semantics = [#tpu.dimension_semantics<parallel>, #tpu.dimension_semantics<arbitrary>], iteration_bounds = array<i64: 1, 1>, scalar_prefetch = 0 : i64, scratch_operands = 2 : i64, tpu.core_type = #tpu.core_type<tc>, window_params = [{transform_indices = @transform_0, window_bounds = array<i64: 8, 2, 4>}, {pipeline_mode = #tpu.pipeline_mode<synchronous>, transform_indices = @transform_1, window_bounds = array<i64: 4, 128>}, {pipeline_mode = #tpu.pipeline_mode<synchronous>, transform_indices = @transform_2, window_bounds = array<i64: 32, 128>}, {pipeline_mode = #tpu.pipeline_mode<synchronous>, transform_indices = @transform_3, window_bounds = array<i64: 1, 128>}, {transform_indices = @transform_4, window_bounds = array<i64: 8, 2, 32>}]} {
    %c0_i32 = arith.constant 0 : i32
    %0 = arith.cmpi eq, %arg1, %c0_i32 : i32
    %1 = arith.extui %0 : i1 to i32
    %c0_i32_0 = arith.constant 0 : i32
    %2 = arith.cmpi ne, %1, %c0_i32_0 : i32
    scf.if %2 {
      %cst_70 = arith.constant 0.000000e+00 : f32
      %242 = vector.broadcast %cst_70 : f32 to vector<2x32xf32>
      %c0_71 = arith.constant 0 : index
      %c0_72 = arith.constant 0 : index
      %243 = vector.load %arg7[%c0_71, %c0_72] : memref<2x32xf32, #tpu.memory_space<vmem>>, vector<2x32xf32>
      tpu.vector_store %arg7[%c0_71, %c0_72], %242 {strides = array<i32>} : memref<2x32xf32, #tpu.memory_space<vmem>>, vector<2x32xf32>,
      %cst_73 = arith.constant 0.000000e+00 : f32
      %244 = vector.broadcast %cst_73 : f32 to vector<2x32xf32>
      %c0_74 = arith.constant 0 : index
      %c0_75 = arith.constant 0 : index
      %245 = vector.load %arg8[%c0_74, %c0_75] : memref<2x32xf32, #tpu.memory_space<vmem>>, vector<2x32xf32>
      tpu.vector_store %arg8[%c0_74, %c0_75], %244 {strides = array<i32>} : memref<2x32xf32, #tpu.memory_space<vmem>>, vector<2x32xf32>,
    } else {
    }
    %c0 = arith.constant 0 : index
    %c0_1 = arith.constant 0 : index
    %3 = vector.load %arg3[%c0, %c0_1] : memref<4x128xbf16, #tpu.memory_space<vmem>>, vector<4x128xbf16>
    %c0_2 = arith.constant 0 : index
    %c0_3 = arith.constant 0 : index
    %4 = vector.load %arg4[%c0_2, %c0_3] : memref<32x128xbf16, #tpu.memory_space<vmem>>, vector<32x128xbf16>
    %c0_4 = arith.constant 0 : index
    %c0_5 = arith.constant 0 : index
    %5 = vector.load %arg5[%c0_4, %c0_5] : memref<1x128xf32, #tpu.memory_space<vmem>>, vector<1x128xf32>
    %c0_6 = arith.constant 0 : index
    %c0_7 = arith.constant 0 : index
    %6 = vector.load %arg7[%c0_6, %c0_7] : memref<2x32xf32, #tpu.memory_space<vmem>>, vector<2x32xf32>
    %c0_8 = arith.constant 0 : index
    %c0_9 = arith.constant 0 : index
    %7 = vector.load %arg8[%c0_8, %c0_9] : memref<2x32xf32, #tpu.memory_space<vmem>>, vector<2x32xf32>
    %c0_i32_10 = arith.constant 0 : i32
    %8 = arith.truncf %6 : vector<2x32xf32> to vector<2x32xbf16>
    %cst = arith.constant dense<0.000000e+00> : vector<2x128xf32>
    %9 = tpu.matmul %8, %4, %cst {dimension_numbers = #tpu.dot_dimension_numbers<[1], [0], [0], [1], [0, 0, 1, 1], [], []>} : vector<2x32xbf16>, vector<32x128xbf16>, vector<2x128xf32> -> vector<2x128xf32>
    %10 = arith.index_cast %c0_i32_10 : i32 to index
    %c0_11 = arith.constant 0 : index
    %c0_12 = arith.constant 0 : index
    %11 = vector.load %arg2[%10, %c0_11, %c0_12] : memref<8x2x4xbf16, #tpu.memory_space<vmem>>, vector<1x2x4xbf16>
    %12 = vector.shape_cast %11 : vector<1x2x4xbf16> to vector<2x4xbf16>
    %cst_13 = arith.constant dense<0.000000e+00> : vector<2x128xf32>
    %13 = tpu.matmul %12, %3, %cst_13 {dimension_numbers = #tpu.dot_dimension_numbers<[1], [0], [0], [1], [0, 0, 1, 1], [], []>} : vector<2x4xbf16>, vector<4x128xbf16>, vector<2x128xf32> -> vector<2x128xf32>
    %14 = vector.broadcast %5 : vector<1x128xf32> to vector<2x128xf32>
    %15 = arith.addf %13, %14 : vector<2x128xf32>
    %16 = arith.addf %15, %9 : vector<2x128xf32>
    %17 = arith.negf %16 : vector<2x128xf32>
    %18 = math.exp %17 : vector<2x128xf32>
    %cst_14 = arith.constant 1.000000e+00 : f32
    %19 = vector.broadcast %cst_14 : f32 to vector<2x128xf32>
    %20 = arith.addf %19, %18 : vector<2x128xf32>
    %21 = arith.divf %19, %20 : vector<2x128xf32>
    %22 = math.tanh %16 : vector<2x128xf32>
    %23 = vector.extract_strided_slice %21 {offsets = [0, 0], sizes = [2, 32], strides = [1, 1]} : vector<2x128xf32> to vector<2x32xf32>
    %24 = vector.extract_strided_slice %21 {offsets = [0, 32], sizes = [2, 32], strides = [1, 1]} : vector<2x128xf32> to vector<2x32xf32>
    %25 = vector.extract_strided_slice %22 {offsets = [0, 64], sizes = [2, 32], strides = [1, 1]} : vector<2x128xf32> to vector<2x32xf32>
    %26 = vector.extract_strided_slice %21 {offsets = [0, 96], sizes = [2, 32], strides = [1, 1]} : vector<2x128xf32> to vector<2x32xf32>
    %27 = arith.mulf %24, %7 : vector<2x32xf32>
    %28 = arith.mulf %23, %25 : vector<2x32xf32>
    %29 = arith.addf %27, %28 : vector<2x32xf32>
    %30 = math.tanh %29 : vector<2x32xf32>
    %31 = arith.mulf %26, %30 : vector<2x32xf32>
    %32 = arith.truncf %31 : vector<2x32xf32> to vector<2x32xbf16>
    %33 = arith.index_cast %c0_i32_10 : i32 to index
    %c0_15 = arith.constant 0 : index
    %c0_16 = arith.constant 0 : index
    %34 = vector.load %arg6[%33, %c0_15, %c0_16] : memref<8x2x32xbf16, #tpu.memory_space<vmem>>, vector<1x2x32xbf16>
    %35 = vector.shape_cast %34 : vector<1x2x32xbf16> to vector<2x32xbf16>
    %36 = vector.shape_cast %32 : vector<2x32xbf16> to vector<1x2x32xbf16>
    tpu.vector_store %arg6[%33, %c0_15, %c0_16], %36 {strides = array<i32>} : memref<8x2x32xbf16, #tpu.memory_space<vmem>>, vector<1x2x32xbf16>,
    %c1_i32 = arith.constant 1 : i32
    %37 = arith.truncf %31 : vector<2x32xf32> to vector<2x32xbf16>
    %cst_17 = arith.constant dense<0.000000e+00> : vector<2x128xf32>
    %38 = tpu.matmul %37, %4, %cst_17 {dimension_numbers = #tpu.dot_dimension_numbers<[1], [0], [0], [1], [0, 0, 1, 1], [], []>} : vector<2x32xbf16>, vector<32x128xbf16>, vector<2x128xf32> -> vector<2x128xf32>
    %39 = arith.index_cast %c1_i32 : i32 to index
    %c0_18 = arith.constant 0 : index
    %c0_19 = arith.constant 0 : index
    %40 = vector.load %arg2[%39, %c0_18, %c0_19] : memref<8x2x4xbf16, #tpu.memory_space<vmem>>, vector<1x2x4xbf16>
    %41 = vector.shape_cast %40 : vector<1x2x4xbf16> to vector<2x4xbf16>
    %cst_20 = arith.constant dense<0.000000e+00> : vector<2x128xf32>
    %42 = tpu.matmul %41, %3, %cst_20 {dimension_numbers = #tpu.dot_dimension_numbers<[1], [0], [0], [1], [0, 0, 1, 1], [], []>} : vector<2x4xbf16>, vector<4x128xbf16>, vector<2x128xf32> -> vector<2x128xf32>
    %43 = vector.broadcast %5 : vector<1x128xf32> to vector<2x128xf32>
    %44 = arith.addf %42, %43 : vector<2x128xf32>
    %45 = arith.addf %44, %38 : vector<2x128xf32>
    %46 = arith.negf %45 : vector<2x128xf32>
    %47 = math.exp %46 : vector<2x128xf32>
    %cst_21 = arith.constant 1.000000e+00 : f32
    %48 = vector.broadcast %cst_21 : f32 to vector<2x128xf32>
    %49 = arith.addf %48, %47 : vector<2x128xf32>
    %50 = arith.divf %48, %49 : vector<2x128xf32>
    %51 = math.tanh %45 : vector<2x128xf32>
    %52 = vector.extract_strided_slice %50 {offsets = [0, 0], sizes = [2, 32], strides = [1, 1]} : vector<2x128xf32> to vector<2x32xf32>
    %53 = vector.extract_strided_slice %50 {offsets = [0, 32], sizes = [2, 32], strides = [1, 1]} : vector<2x128xf32> to vector<2x32xf32>
    %54 = vector.extract_strided_slice %51 {offsets = [0, 64], sizes = [2, 32], strides = [1, 1]} : vector<2x128xf32> to vector<2x32xf32>
    %55 = vector.extract_strided_slice %50 {offsets = [0, 96], sizes = [2, 32], strides = [1, 1]} : vector<2x128xf32> to vector<2x32xf32>
    %56 = arith.mulf %53, %29 : vector<2x32xf32>
    %57 = arith.mulf %52, %54 : vector<2x32xf32>
    %58 = arith.addf %56, %57 : vector<2x32xf32>
    %59 = math.tanh %58 : vector<2x32xf32>
    %60 = arith.mulf %55, %59 : vector<2x32xf32>
    %61 = arith.truncf %60 : vector<2x32xf32> to vector<2x32xbf16>
    %62 = arith.index_cast %c1_i32 : i32 to index
    %c0_22 = arith.constant 0 : index
    %c0_23 = arith.constant 0 : index
    %63 = vector.load %arg6[%62, %c0_22, %c0_23] : memref<8x2x32xbf16, #tpu.memory_space<vmem>>, vector<1x2x32xbf16>
    %64 = vector.shape_cast %63 : vector<1x2x32xbf16> to vector<2x32xbf16>
    %65 = vector.shape_cast %61 : vector<2x32xbf16> to vector<1x2x32xbf16>
    tpu.vector_store %arg6[%62, %c0_22, %c0_23], %65 {strides = array<i32>} : memref<8x2x32xbf16, #tpu.memory_space<vmem>>, vector<1x2x32xbf16>,
    %c2_i32 = arith.constant 2 : i32
    %66 = arith.truncf %60 : vector<2x32xf32> to vector<2x32xbf16>
    %cst_24 = arith.constant dense<0.000000e+00> : vector<2x128xf32>
    %67 = tpu.matmul %66, %4, %cst_24 {dimension_numbers = #tpu.dot_dimension_numbers<[1], [0], [0], [1], [0, 0, 1, 1], [], []>} : vector<2x32xbf16>, vector<32x128xbf16>, vector<2x128xf32> -> vector<2x128xf32>
    %68 = arith.index_cast %c2_i32 : i32 to index
    %c0_25 = arith.constant 0 : index
    %c0_26 = arith.constant 0 : index
    %69 = vector.load %arg2[%68, %c0_25, %c0_26] : memref<8x2x4xbf16, #tpu.memory_space<vmem>>, vector<1x2x4xbf16>
    %70 = vector.shape_cast %69 : vector<1x2x4xbf16> to vector<2x4xbf16>
    %cst_27 = arith.constant dense<0.000000e+00> : vector<2x128xf32>
    %71 = tpu.matmul %70, %3, %cst_27 {dimension_numbers = #tpu.dot_dimension_numbers<[1], [0], [0], [1], [0, 0, 1, 1], [], []>} : vector<2x4xbf16>, vector<4x128xbf16>, vector<2x128xf32> -> vector<2x128xf32>
    %72 = vector.broadcast %5 : vector<1x128xf32> to vector<2x128xf32>
    %73 = arith.addf %71, %72 : vector<2x128xf32>
    %74 = arith.addf %73, %67 : vector<2x128xf32>
    %75 = arith.negf %74 : vector<2x128xf32>
    %76 = math.exp %75 : vector<2x128xf32>
    %cst_28 = arith.constant 1.000000e+00 : f32
    %77 = vector.broadcast %cst_28 : f32 to vector<2x128xf32>
    %78 = arith.addf %77, %76 : vector<2x128xf32>
    %79 = arith.divf %77, %78 : vector<2x128xf32>
    %80 = math.tanh %74 : vector<2x128xf32>
    %81 = vector.extract_strided_slice %79 {offsets = [0, 0], sizes = [2, 32], strides = [1, 1]} : vector<2x128xf32> to vector<2x32xf32>
    %82 = vector.extract_strided_slice %79 {offsets = [0, 32], sizes = [2, 32], strides = [1, 1]} : vector<2x128xf32> to vector<2x32xf32>
    %83 = vector.extract_strided_slice %80 {offsets = [0, 64], sizes = [2, 32], strides = [1, 1]} : vector<2x128xf32> to vector<2x32xf32>
    %84 = vector.extract_strided_slice %79 {offsets = [0, 96], sizes = [2, 32], strides = [1, 1]} : vector<2x128xf32> to vector<2x32xf32>
    %85 = arith.mulf %82, %58 : vector<2x32xf32>
    %86 = arith.mulf %81, %83 : vector<2x32xf32>
    %87 = arith.addf %85, %86 : vector<2x32xf32>
    %88 = math.tanh %87 : vector<2x32xf32>
    %89 = arith.mulf %84, %88 : vector<2x32xf32>
    %90 = arith.truncf %89 : vector<2x32xf32> to vector<2x32xbf16>
    %91 = arith.index_cast %c2_i32 : i32 to index
    %c0_29 = arith.constant 0 : index
    %c0_30 = arith.constant 0 : index
    %92 = vector.load %arg6[%91, %c0_29, %c0_30] : memref<8x2x32xbf16, #tpu.memory_space<vmem>>, vector<1x2x32xbf16>
    %93 = vector.shape_cast %92 : vector<1x2x32xbf16> to vector<2x32xbf16>
    %94 = vector.shape_cast %90 : vector<2x32xbf16> to vector<1x2x32xbf16>
    tpu.vector_store %arg6[%91, %c0_29, %c0_30], %94 {strides = array<i32>} : memref<8x2x32xbf16, #tpu.memory_space<vmem>>, vector<1x2x32xbf16>,
    %c3_i32 = arith.constant 3 : i32
    %95 = arith.truncf %89 : vector<2x32xf32> to vector<2x32xbf16>
    %cst_31 = arith.constant dense<0.000000e+00> : vector<2x128xf32>
    %96 = tpu.matmul %95, %4, %cst_31 {dimension_numbers = #tpu.dot_dimension_numbers<[1], [0], [0], [1], [0, 0, 1, 1], [], []>} : vector<2x32xbf16>, vector<32x128xbf16>, vector<2x128xf32> -> vector<2x128xf32>
    %97 = arith.index_cast %c3_i32 : i32 to index
    %c0_32 = arith.constant 0 : index
    %c0_33 = arith.constant 0 : index
    %98 = vector.load %arg2[%97, %c0_32, %c0_33] : memref<8x2x4xbf16, #tpu.memory_space<vmem>>, vector<1x2x4xbf16>
    %99 = vector.shape_cast %98 : vector<1x2x4xbf16> to vector<2x4xbf16>
    %cst_34 = arith.constant dense<0.000000e+00> : vector<2x128xf32>
    %100 = tpu.matmul %99, %3, %cst_34 {dimension_numbers = #tpu.dot_dimension_numbers<[1], [0], [0], [1], [0, 0, 1, 1], [], []>} : vector<2x4xbf16>, vector<4x128xbf16>, vector<2x128xf32> -> vector<2x128xf32>
    %101 = vector.broadcast %5 : vector<1x128xf32> to vector<2x128xf32>
    %102 = arith.addf %100, %101 : vector<2x128xf32>
    %103 = arith.addf %102, %96 : vector<2x128xf32>
    %104 = arith.negf %103 : vector<2x128xf32>
    %105 = math.exp %104 : vector<2x128xf32>
    %cst_35 = arith.constant 1.000000e+00 : f32
    %106 = vector.broadcast %cst_35 : f32 to vector<2x128xf32>
    %107 = arith.addf %106, %105 : vector<2x128xf32>
    %108 = arith.divf %106, %107 : vector<2x128xf32>
    %109 = math.tanh %103 : vector<2x128xf32>
    %110 = vector.extract_strided_slice %108 {offsets = [0, 0], sizes = [2, 32], strides = [1, 1]} : vector<2x128xf32> to vector<2x32xf32>
    %111 = vector.extract_strided_slice %108 {offsets = [0, 32], sizes = [2, 32], strides = [1, 1]} : vector<2x128xf32> to vector<2x32xf32>
    %112 = vector.extract_strided_slice %109 {offsets = [0, 64], sizes = [2, 32], strides = [1, 1]} : vector<2x128xf32> to vector<2x32xf32>
    %113 = vector.extract_strided_slice %108 {offsets = [0, 96], sizes = [2, 32], strides = [1, 1]} : vector<2x128xf32> to vector<2x32xf32>
    %114 = arith.mulf %111, %87 : vector<2x32xf32>
    %115 = arith.mulf %110, %112 : vector<2x32xf32>
    %116 = arith.addf %114, %115 : vector<2x32xf32>
    %117 = math.tanh %116 : vector<2x32xf32>
    %118 = arith.mulf %113, %117 : vector<2x32xf32>
    %119 = arith.truncf %118 : vector<2x32xf32> to vector<2x32xbf16>
    %120 = arith.index_cast %c3_i32 : i32 to index
    %c0_36 = arith.constant 0 : index
    %c0_37 = arith.constant 0 : index
    %121 = vector.load %arg6[%120, %c0_36, %c0_37] : memref<8x2x32xbf16, #tpu.memory_space<vmem>>, vector<1x2x32xbf16>
    %122 = vector.shape_cast %121 : vector<1x2x32xbf16> to vector<2x32xbf16>
    %123 = vector.shape_cast %119 : vector<2x32xbf16> to vector<1x2x32xbf16>
    tpu.vector_store %arg6[%120, %c0_36, %c0_37], %123 {strides = array<i32>} : memref<8x2x32xbf16, #tpu.memory_space<vmem>>, vector<1x2x32xbf16>,
    %c4_i32 = arith.constant 4 : i32
    %124 = arith.truncf %118 : vector<2x32xf32> to vector<2x32xbf16>
    %cst_38 = arith.constant dense<0.000000e+00> : vector<2x128xf32>
    %125 = tpu.matmul %124, %4, %cst_38 {dimension_numbers = #tpu.dot_dimension_numbers<[1], [0], [0], [1], [0, 0, 1, 1], [], []>} : vector<2x32xbf16>, vector<32x128xbf16>, vector<2x128xf32> -> vector<2x128xf32>
    %126 = arith.index_cast %c4_i32 : i32 to index
    %c0_39 = arith.constant 0 : index
    %c0_40 = arith.constant 0 : index
    %127 = vector.load %arg2[%126, %c0_39, %c0_40] : memref<8x2x4xbf16, #tpu.memory_space<vmem>>, vector<1x2x4xbf16>
    %128 = vector.shape_cast %127 : vector<1x2x4xbf16> to vector<2x4xbf16>
    %cst_41 = arith.constant dense<0.000000e+00> : vector<2x128xf32>
    %129 = tpu.matmul %128, %3, %cst_41 {dimension_numbers = #tpu.dot_dimension_numbers<[1], [0], [0], [1], [0, 0, 1, 1], [], []>} : vector<2x4xbf16>, vector<4x128xbf16>, vector<2x128xf32> -> vector<2x128xf32>
    %130 = vector.broadcast %5 : vector<1x128xf32> to vector<2x128xf32>
    %131 = arith.addf %129, %130 : vector<2x128xf32>
    %132 = arith.addf %131, %125 : vector<2x128xf32>
    %133 = arith.negf %132 : vector<2x128xf32>
    %134 = math.exp %133 : vector<2x128xf32>
    %cst_42 = arith.constant 1.000000e+00 : f32
    %135 = vector.broadcast %cst_42 : f32 to vector<2x128xf32>
    %136 = arith.addf %135, %134 : vector<2x128xf32>
    %137 = arith.divf %135, %136 : vector<2x128xf32>
    %138 = math.tanh %132 : vector<2x128xf32>
    %139 = vector.extract_strided_slice %137 {offsets = [0, 0], sizes = [2, 32], strides = [1, 1]} : vector<2x128xf32> to vector<2x32xf32>
    %140 = vector.extract_strided_slice %137 {offsets = [0, 32], sizes = [2, 32], strides = [1, 1]} : vector<2x128xf32> to vector<2x32xf32>
    %141 = vector.extract_strided_slice %138 {offsets = [0, 64], sizes = [2, 32], strides = [1, 1]} : vector<2x128xf32> to vector<2x32xf32>
    %142 = vector.extract_strided_slice %137 {offsets = [0, 96], sizes = [2, 32], strides = [1, 1]} : vector<2x128xf32> to vector<2x32xf32>
    %143 = arith.mulf %140, %116 : vector<2x32xf32>
    %144 = arith.mulf %139, %141 : vector<2x32xf32>
    %145 = arith.addf %143, %144 : vector<2x32xf32>
    %146 = math.tanh %145 : vector<2x32xf32>
    %147 = arith.mulf %142, %146 : vector<2x32xf32>
    %148 = arith.truncf %147 : vector<2x32xf32> to vector<2x32xbf16>
    %149 = arith.index_cast %c4_i32 : i32 to index
    %c0_43 = arith.constant 0 : index
    %c0_44 = arith.constant 0 : index
    %150 = vector.load %arg6[%149, %c0_43, %c0_44] : memref<8x2x32xbf16, #tpu.memory_space<vmem>>, vector<1x2x32xbf16>
    %151 = vector.shape_cast %150 : vector<1x2x32xbf16> to vector<2x32xbf16>
    %152 = vector.shape_cast %148 : vector<2x32xbf16> to vector<1x2x32xbf16>
    tpu.vector_store %arg6[%149, %c0_43, %c0_44], %152 {strides = array<i32>} : memref<8x2x32xbf16, #tpu.memory_space<vmem>>, vector<1x2x32xbf16>,
    %c5_i32 = arith.constant 5 : i32
    %153 = arith.truncf %147 : vector<2x32xf32> to vector<2x32xbf16>
    %cst_45 = arith.constant dense<0.000000e+00> : vector<2x128xf32>
    %154 = tpu.matmul %153, %4, %cst_45 {dimension_numbers = #tpu.dot_dimension_numbers<[1], [0], [0], [1], [0, 0, 1, 1], [], []>} : vector<2x32xbf16>, vector<32x128xbf16>, vector<2x128xf32> -> vector<2x128xf32>
    %155 = arith.index_cast %c5_i32 : i32 to index
    %c0_46 = arith.constant 0 : index
    %c0_47 = arith.constant 0 : index
    %156 = vector.load %arg2[%155, %c0_46, %c0_47] : memref<8x2x4xbf16, #tpu.memory_space<vmem>>, vector<1x2x4xbf16>
    %157 = vector.shape_cast %156 : vector<1x2x4xbf16> to vector<2x4xbf16>
    %cst_48 = arith.constant dense<0.000000e+00> : vector<2x128xf32>
    %158 = tpu.matmul %157, %3, %cst_48 {dimension_numbers = #tpu.dot_dimension_numbers<[1], [0], [0], [1], [0, 0, 1, 1], [], []>} : vector<2x4xbf16>, vector<4x128xbf16>, vector<2x128xf32> -> vector<2x128xf32>
    %159 = vector.broadcast %5 : vector<1x128xf32> to vector<2x128xf32>
    %160 = arith.addf %158, %159 : vector<2x128xf32>
    %161 = arith.addf %160, %154 : vector<2x128xf32>
    %162 = arith.negf %161 : vector<2x128xf32>
    %163 = math.exp %162 : vector<2x128xf32>
    %cst_49 = arith.constant 1.000000e+00 : f32
    %164 = vector.broadcast %cst_49 : f32 to vector<2x128xf32>
    %165 = arith.addf %164, %163 : vector<2x128xf32>
    %166 = arith.divf %164, %165 : vector<2x128xf32>
    %167 = math.tanh %161 : vector<2x128xf32>
    %168 = vector.extract_strided_slice %166 {offsets = [0, 0], sizes = [2, 32], strides = [1, 1]} : vector<2x128xf32> to vector<2x32xf32>
    %169 = vector.extract_strided_slice %166 {offsets = [0, 32], sizes = [2, 32], strides = [1, 1]} : vector<2x128xf32> to vector<2x32xf32>
    %170 = vector.extract_strided_slice %167 {offsets = [0, 64], sizes = [2, 32], strides = [1, 1]} : vector<2x128xf32> to vector<2x32xf32>
    %171 = vector.extract_strided_slice %166 {offsets = [0, 96], sizes = [2, 32], strides = [1, 1]} : vector<2x128xf32> to vector<2x32xf32>
    %172 = arith.mulf %169, %145 : vector<2x32xf32>
    %173 = arith.mulf %168, %170 : vector<2x32xf32>
    %174 = arith.addf %172, %173 : vector<2x32xf32>
    %175 = math.tanh %174 : vector<2x32xf32>
    %176 = arith.mulf %171, %175 : vector<2x32xf32>
    %177 = arith.truncf %176 : vector<2x32xf32> to vector<2x32xbf16>
    %178 = arith.index_cast %c5_i32 : i32 to index
    %c0_50 = arith.constant 0 : index
    %c0_51 = arith.constant 0 : index
    %179 = vector.load %arg6[%178, %c0_50, %c0_51] : memref<8x2x32xbf16, #tpu.memory_space<vmem>>, vector<1x2x32xbf16>
    %180 = vector.shape_cast %179 : vector<1x2x32xbf16> to vector<2x32xbf16>
    %181 = vector.shape_cast %177 : vector<2x32xbf16> to vector<1x2x32xbf16>
    tpu.vector_store %arg6[%178, %c0_50, %c0_51], %181 {strides = array<i32>} : memref<8x2x32xbf16, #tpu.memory_space<vmem>>, vector<1x2x32xbf16>,
    %c6_i32 = arith.constant 6 : i32
    %182 = arith.truncf %176 : vector<2x32xf32> to vector<2x32xbf16>
    %cst_52 = arith.constant dense<0.000000e+00> : vector<2x128xf32>
    %183 = tpu.matmul %182, %4, %cst_52 {dimension_numbers = #tpu.dot_dimension_numbers<[1], [0], [0], [1], [0, 0, 1, 1], [], []>} : vector<2x32xbf16>, vector<32x128xbf16>, vector<2x128xf32> -> vector<2x128xf32>
    %184 = arith.index_cast %c6_i32 : i32 to index
    %c0_53 = arith.constant 0 : index
    %c0_54 = arith.constant 0 : index
    %185 = vector.load %arg2[%184, %c0_53, %c0_54] : memref<8x2x4xbf16, #tpu.memory_space<vmem>>, vector<1x2x4xbf16>
    %186 = vector.shape_cast %185 : vector<1x2x4xbf16> to vector<2x4xbf16>
    %cst_55 = arith.constant dense<0.000000e+00> : vector<2x128xf32>
    %187 = tpu.matmul %186, %3, %cst_55 {dimension_numbers = #tpu.dot_dimension_numbers<[1], [0], [0], [1], [0, 0, 1, 1], [], []>} : vector<2x4xbf16>, vector<4x128xbf16>, vector<2x128xf32> -> vector<2x128xf32>
    %188 = vector.broadcast %5 : vector<1x128xf32> to vector<2x128xf32>
    %189 = arith.addf %187, %188 : vector<2x128xf32>
    %190 = arith.addf %189, %183 : vector<2x128xf32>
    %191 = arith.negf %190 : vector<2x128xf32>
    %192 = math.exp %191 : vector<2x128xf32>
    %cst_56 = arith.constant 1.000000e+00 : f32
    %193 = vector.broadcast %cst_56 : f32 to vector<2x128xf32>
    %194 = arith.addf %193, %192 : vector<2x128xf32>
    %195 = arith.divf %193, %194 : vector<2x128xf32>
    %196 = math.tanh %190 : vector<2x128xf32>
    %197 = vector.extract_strided_slice %195 {offsets = [0, 0], sizes = [2, 32], strides = [1, 1]} : vector<2x128xf32> to vector<2x32xf32>
    %198 = vector.extract_strided_slice %195 {offsets = [0, 32], sizes = [2, 32], strides = [1, 1]} : vector<2x128xf32> to vector<2x32xf32>
    %199 = vector.extract_strided_slice %196 {offsets = [0, 64], sizes = [2, 32], strides = [1, 1]} : vector<2x128xf32> to vector<2x32xf32>
    %200 = vector.extract_strided_slice %195 {offsets = [0, 96], sizes = [2, 32], strides = [1, 1]} : vector<2x128xf32> to vector<2x32xf32>
    %201 = arith.mulf %198, %174 : vector<2x32xf32>
    %202 = arith.mulf %197, %199 : vector<2x32xf32>
    %203 = arith.addf %201, %202 : vector<2x32xf32>
    %204 = math.tanh %203 : vector<2x32xf32>
    %205 = arith.mulf %200, %204 : vector<2x32xf32>
    %206 = arith.truncf %205 : vector<2x32xf32> to vector<2x32xbf16>
    %207 = arith.index_cast %c6_i32 : i32 to index
    %c0_57 = arith.constant 0 : index
    %c0_58 = arith.constant 0 : index
    %208 = vector.load %arg6[%207, %c0_57, %c0_58] : memref<8x2x32xbf16, #tpu.memory_space<vmem>>, vector<1x2x32xbf16>
    %209 = vector.shape_cast %208 : vector<1x2x32xbf16> to vector<2x32xbf16>
    %210 = vector.shape_cast %206 : vector<2x32xbf16> to vector<1x2x32xbf16>
    tpu.vector_store %arg6[%207, %c0_57, %c0_58], %210 {strides = array<i32>} : memref<8x2x32xbf16, #tpu.memory_space<vmem>>, vector<1x2x32xbf16>,
    %c7_i32 = arith.constant 7 : i32
    %211 = arith.truncf %205 : vector<2x32xf32> to vector<2x32xbf16>
    %cst_59 = arith.constant dense<0.000000e+00> : vector<2x128xf32>
    %212 = tpu.matmul %211, %4, %cst_59 {dimension_numbers = #tpu.dot_dimension_numbers<[1], [0], [0], [1], [0, 0, 1, 1], [], []>} : vector<2x32xbf16>, vector<32x128xbf16>, vector<2x128xf32> -> vector<2x128xf32>
    %213 = arith.index_cast %c7_i32 : i32 to index
    %c0_60 = arith.constant 0 : index
    %c0_61 = arith.constant 0 : index
    %214 = vector.load %arg2[%213, %c0_60, %c0_61] : memref<8x2x4xbf16, #tpu.memory_space<vmem>>, vector<1x2x4xbf16>
    %215 = vector.shape_cast %214 : vector<1x2x4xbf16> to vector<2x4xbf16>
    %cst_62 = arith.constant dense<0.000000e+00> : vector<2x128xf32>
    %216 = tpu.matmul %215, %3, %cst_62 {dimension_numbers = #tpu.dot_dimension_numbers<[1], [0], [0], [1], [0, 0, 1, 1], [], []>} : vector<2x4xbf16>, vector<4x128xbf16>, vector<2x128xf32> -> vector<2x128xf32>
    %217 = vector.broadcast %5 : vector<1x128xf32> to vector<2x128xf32>
    %218 = arith.addf %216, %217 : vector<2x128xf32>
    %219 = arith.addf %218, %212 : vector<2x128xf32>
    %220 = arith.negf %219 : vector<2x128xf32>
    %221 = math.exp %220 : vector<2x128xf32>
    %cst_63 = arith.constant 1.000000e+00 : f32
    %222 = vector.broadcast %cst_63 : f32 to vector<2x128xf32>
    %223 = arith.addf %222, %221 : vector<2x128xf32>
    %224 = arith.divf %222, %223 : vector<2x128xf32>
    %225 = math.tanh %219 : vector<2x128xf32>
    %226 = vector.extract_strided_slice %224 {offsets = [0, 0], sizes = [2, 32], strides = [1, 1]} : vector<2x128xf32> to vector<2x32xf32>
    %227 = vector.extract_strided_slice %224 {offsets = [0, 32], sizes = [2, 32], strides = [1, 1]} : vector<2x128xf32> to vector<2x32xf32>
    %228 = vector.extract_strided_slice %225 {offsets = [0, 64], sizes = [2, 32], strides = [1, 1]} : vector<2x128xf32> to vector<2x32xf32>
    %229 = vector.extract_strided_slice %224 {offsets = [0, 96], sizes = [2, 32], strides = [1, 1]} : vector<2x128xf32> to vector<2x32xf32>
    %230 = arith.mulf %227, %203 : vector<2x32xf32>
    %231 = arith.mulf %226, %228 : vector<2x32xf32>
    %232 = arith.addf %230, %231 : vector<2x32xf32>
    %233 = math.tanh %232 : vector<2x32xf32>
    %234 = arith.mulf %229, %233 : vector<2x32xf32>
    %235 = arith.truncf %234 : vector<2x32xf32> to vector<2x32xbf16>
    %236 = arith.index_cast %c7_i32 : i32 to index
    %c0_64 = arith.constant 0 : index
    %c0_65 = arith.constant 0 : index
    %237 = vector.load %arg6[%236, %c0_64, %c0_65] : memref<8x2x32xbf16, #tpu.memory_space<vmem>>, vector<1x2x32xbf16>
    %238 = vector.shape_cast %237 : vector<1x2x32xbf16> to vector<2x32xbf16>
    %239 = vector.shape_cast %235 : vector<2x32xbf16> to vector<1x2x32xbf16>
    tpu.vector_store %arg6[%236, %c0_64, %c0_65], %239 {strides = array<i32>} : memref<8x2x32xbf16, #tpu.memory_space<vmem>>, vector<1x2x32xbf16>,
    %c8_i32 = arith.constant 8 : i32
    %c0_66 = arith.constant 0 : index
    %c0_67 = arith.constant 0 : index
    %240 = vector.load %arg7[%c0_66, %c0_67] : memref<2x32xf32, #tpu.memory_space<vmem>>, vector<2x32xf32>
    tpu.vector_store %arg7[%c0_66, %c0_67], %234 {strides = array<i32>} : memref<2x32xf32, #tpu.memory_space<vmem>>, vector<2x32xf32>,
    %c0_68 = arith.constant 0 : index
    %c0_69 = arith.constant 0 : index
    %241 = vector.load %arg8[%c0_68, %c0_69] : memref<2x32xf32, #tpu.memory_space<vmem>>, vector<2x32xf32>
    tpu.vector_store %arg8[%c0_68, %c0_69], %232 {strides = array<i32>} : memref<2x32xf32, #tpu.memory_space<vmem>>, vector<2x32xf32>,
    return
  }
  func.func @transform_0(%arg0: i32, %arg1: i32) -> (i32, i32, i32) {
    %c0_i32 = arith.constant 0 : i32
    %c0_i32_0 = arith.constant 0 : i32
    return %arg1, %arg0, %c0_i32 : i32, i32, i32
  }
  func.func @transform_1(%arg0: i32, %arg1: i32) -> (i32, i32) {
    %c0_i32 = arith.constant 0 : i32
    %c0_i32_0 = arith.constant 0 : i32
    %c0_i32_1 = arith.constant 0 : i32
    return %c0_i32, %c0_i32_0 : i32, i32
  }
  func.func @transform_2(%arg0: i32, %arg1: i32) -> (i32, i32) {
    %c0_i32 = arith.constant 0 : i32
    %c0_i32_0 = arith.constant 0 : i32
    %c0_i32_1 = arith.constant 0 : i32
    return %c0_i32, %c0_i32_0 : i32, i32
  }
  func.func @transform_3(%arg0: i32, %arg1: i32) -> (i32, i32) {
    %c0_i32 = arith.constant 0 : i32
    %c0_i32_0 = arith.constant 0 : i32
    %c0_i32_1 = arith.constant 0 : i32
    return %c0_i32, %c0_i32_0 : i32, i32
  }
  func.func @transform_4(%arg0: i32, %arg1: i32) -> (i32, i32, i32) {
    %c0_i32 = arith.constant 0 : i32
    %c0_i32_0 = arith.constant 0 : i32
    return %arg1, %arg0, %c0_i32 : i32, i32, i32
  }
}

module attributes {stable_mosaic.version = 11 : i64} {
  func.func @_lstm_layer_kernel(%arg0: i32, %arg1: i32, %arg2: memref<8x2x32xbf16, #tpu.memory_space<vmem>>, %arg3: memref<32x128xbf16, #tpu.memory_space<vmem>>, %arg4: memref<32x128xbf16, #tpu.memory_space<vmem>>, %arg5: memref<1x128xf32, #tpu.memory_space<vmem>>, %arg6: memref<32x1xf32, #tpu.memory_space<vmem>>, %arg7: memref<1x1xf32, #tpu.memory_space<vmem>>, %arg8: memref<2x1xf32, #tpu.memory_space<vmem>>, %arg9: memref<2x32xf32, #tpu.memory_space<vmem>>, %arg10: memref<2x32xf32, #tpu.memory_space<vmem>>) attributes {dimension_semantics = [#tpu.dimension_semantics<parallel>, #tpu.dimension_semantics<arbitrary>], iteration_bounds = array<i64: 1, 1>, scalar_prefetch = 0 : i64, scratch_operands = 2 : i64, tpu.core_type = #tpu.core_type<tc>, window_params = [{transform_indices = @transform_0, window_bounds = array<i64: 8, 2, 32>}, {pipeline_mode = #tpu.pipeline_mode<synchronous>, transform_indices = @transform_1, window_bounds = array<i64: 32, 128>}, {pipeline_mode = #tpu.pipeline_mode<synchronous>, transform_indices = @transform_2, window_bounds = array<i64: 32, 128>}, {pipeline_mode = #tpu.pipeline_mode<synchronous>, transform_indices = @transform_3, window_bounds = array<i64: 1, 128>}, {pipeline_mode = #tpu.pipeline_mode<synchronous>, transform_indices = @transform_4, window_bounds = array<i64: 32, 1>}, {pipeline_mode = #tpu.pipeline_mode<synchronous>, transform_indices = @transform_5, window_bounds = array<i64: 1, 1>}, {transform_indices = @transform_6, window_bounds = array<i64: 2, 1>}]} {
    %c0_i32 = arith.constant 0 : i32
    %0 = arith.cmpi eq, %arg1, %c0_i32 : i32
    %1 = arith.extui %0 : i1 to i32
    %c0_i32_0 = arith.constant 0 : i32
    %2 = arith.cmpi ne, %1, %c0_i32_0 : i32
    scf.if %2 {
      %cst_56 = arith.constant 0.000000e+00 : f32
      %205 = vector.broadcast %cst_56 : f32 to vector<2x32xf32>
      %c0_57 = arith.constant 0 : index
      %c0_58 = arith.constant 0 : index
      %206 = vector.load %arg9[%c0_57, %c0_58] : memref<2x32xf32, #tpu.memory_space<vmem>>, vector<2x32xf32>
      tpu.vector_store %arg9[%c0_57, %c0_58], %205 {strides = array<i32>} : memref<2x32xf32, #tpu.memory_space<vmem>>, vector<2x32xf32>,
      %cst_59 = arith.constant 0.000000e+00 : f32
      %207 = vector.broadcast %cst_59 : f32 to vector<2x32xf32>
      %c0_60 = arith.constant 0 : index
      %c0_61 = arith.constant 0 : index
      %208 = vector.load %arg10[%c0_60, %c0_61] : memref<2x32xf32, #tpu.memory_space<vmem>>, vector<2x32xf32>
      tpu.vector_store %arg10[%c0_60, %c0_61], %207 {strides = array<i32>} : memref<2x32xf32, #tpu.memory_space<vmem>>, vector<2x32xf32>,
    } else {
    }
    %c0 = arith.constant 0 : index
    %c0_1 = arith.constant 0 : index
    %3 = vector.load %arg3[%c0, %c0_1] : memref<32x128xbf16, #tpu.memory_space<vmem>>, vector<32x128xbf16>
    %c0_2 = arith.constant 0 : index
    %c0_3 = arith.constant 0 : index
    %4 = vector.load %arg4[%c0_2, %c0_3] : memref<32x128xbf16, #tpu.memory_space<vmem>>, vector<32x128xbf16>
    %c0_4 = arith.constant 0 : index
    %c0_5 = arith.constant 0 : index
    %5 = vector.load %arg5[%c0_4, %c0_5] : memref<1x128xf32, #tpu.memory_space<vmem>>, vector<1x128xf32>
    %c0_6 = arith.constant 0 : index
    %c0_7 = arith.constant 0 : index
    %6 = vector.load %arg9[%c0_6, %c0_7] : memref<2x32xf32, #tpu.memory_space<vmem>>, vector<2x32xf32>
    %c0_8 = arith.constant 0 : index
    %c0_9 = arith.constant 0 : index
    %7 = vector.load %arg10[%c0_8, %c0_9] : memref<2x32xf32, #tpu.memory_space<vmem>>, vector<2x32xf32>
    %c0_i32_10 = arith.constant 0 : i32
    %8 = arith.truncf %6 : vector<2x32xf32> to vector<2x32xbf16>
    %cst = arith.constant dense<0.000000e+00> : vector<2x128xf32>
    %9 = tpu.matmul %8, %4, %cst {dimension_numbers = #tpu.dot_dimension_numbers<[1], [0], [0], [1], [0, 0, 1, 1], [], []>} : vector<2x32xbf16>, vector<32x128xbf16>, vector<2x128xf32> -> vector<2x128xf32>
    %10 = arith.index_cast %c0_i32_10 : i32 to index
    %c0_11 = arith.constant 0 : index
    %c0_12 = arith.constant 0 : index
    %11 = vector.load %arg2[%10, %c0_11, %c0_12] : memref<8x2x32xbf16, #tpu.memory_space<vmem>>, vector<1x2x32xbf16>
    %12 = vector.shape_cast %11 : vector<1x2x32xbf16> to vector<2x32xbf16>
    %cst_13 = arith.constant dense<0.000000e+00> : vector<2x128xf32>
    %13 = tpu.matmul %12, %3, %cst_13 {dimension_numbers = #tpu.dot_dimension_numbers<[1], [0], [0], [1], [0, 0, 1, 1], [], []>} : vector<2x32xbf16>, vector<32x128xbf16>, vector<2x128xf32> -> vector<2x128xf32>
    %14 = vector.broadcast %5 : vector<1x128xf32> to vector<2x128xf32>
    %15 = arith.addf %13, %14 : vector<2x128xf32>
    %16 = arith.addf %15, %9 : vector<2x128xf32>
    %17 = arith.negf %16 : vector<2x128xf32>
    %18 = math.exp %17 : vector<2x128xf32>
    %cst_14 = arith.constant 1.000000e+00 : f32
    %19 = vector.broadcast %cst_14 : f32 to vector<2x128xf32>
    %20 = arith.addf %19, %18 : vector<2x128xf32>
    %21 = arith.divf %19, %20 : vector<2x128xf32>
    %22 = math.tanh %16 : vector<2x128xf32>
    %23 = vector.extract_strided_slice %21 {offsets = [0, 0], sizes = [2, 32], strides = [1, 1]} : vector<2x128xf32> to vector<2x32xf32>
    %24 = vector.extract_strided_slice %21 {offsets = [0, 32], sizes = [2, 32], strides = [1, 1]} : vector<2x128xf32> to vector<2x32xf32>
    %25 = vector.extract_strided_slice %22 {offsets = [0, 64], sizes = [2, 32], strides = [1, 1]} : vector<2x128xf32> to vector<2x32xf32>
    %26 = vector.extract_strided_slice %21 {offsets = [0, 96], sizes = [2, 32], strides = [1, 1]} : vector<2x128xf32> to vector<2x32xf32>
    %27 = arith.mulf %24, %7 : vector<2x32xf32>
    %28 = arith.mulf %23, %25 : vector<2x32xf32>
    %29 = arith.addf %27, %28 : vector<2x32xf32>
    %30 = math.tanh %29 : vector<2x32xf32>
    %31 = arith.mulf %26, %30 : vector<2x32xf32>
    %c1_i32 = arith.constant 1 : i32
    %32 = arith.truncf %31 : vector<2x32xf32> to vector<2x32xbf16>
    %cst_15 = arith.constant dense<0.000000e+00> : vector<2x128xf32>
    %33 = tpu.matmul %32, %4, %cst_15 {dimension_numbers = #tpu.dot_dimension_numbers<[1], [0], [0], [1], [0, 0, 1, 1], [], []>} : vector<2x32xbf16>, vector<32x128xbf16>, vector<2x128xf32> -> vector<2x128xf32>
    %34 = arith.index_cast %c1_i32 : i32 to index
    %c0_16 = arith.constant 0 : index
    %c0_17 = arith.constant 0 : index
    %35 = vector.load %arg2[%34, %c0_16, %c0_17] : memref<8x2x32xbf16, #tpu.memory_space<vmem>>, vector<1x2x32xbf16>
    %36 = vector.shape_cast %35 : vector<1x2x32xbf16> to vector<2x32xbf16>
    %cst_18 = arith.constant dense<0.000000e+00> : vector<2x128xf32>
    %37 = tpu.matmul %36, %3, %cst_18 {dimension_numbers = #tpu.dot_dimension_numbers<[1], [0], [0], [1], [0, 0, 1, 1], [], []>} : vector<2x32xbf16>, vector<32x128xbf16>, vector<2x128xf32> -> vector<2x128xf32>
    %38 = vector.broadcast %5 : vector<1x128xf32> to vector<2x128xf32>
    %39 = arith.addf %37, %38 : vector<2x128xf32>
    %40 = arith.addf %39, %33 : vector<2x128xf32>
    %41 = arith.negf %40 : vector<2x128xf32>
    %42 = math.exp %41 : vector<2x128xf32>
    %cst_19 = arith.constant 1.000000e+00 : f32
    %43 = vector.broadcast %cst_19 : f32 to vector<2x128xf32>
    %44 = arith.addf %43, %42 : vector<2x128xf32>
    %45 = arith.divf %43, %44 : vector<2x128xf32>
    %46 = math.tanh %40 : vector<2x128xf32>
    %47 = vector.extract_strided_slice %45 {offsets = [0, 0], sizes = [2, 32], strides = [1, 1]} : vector<2x128xf32> to vector<2x32xf32>
    %48 = vector.extract_strided_slice %45 {offsets = [0, 32], sizes = [2, 32], strides = [1, 1]} : vector<2x128xf32> to vector<2x32xf32>
    %49 = vector.extract_strided_slice %46 {offsets = [0, 64], sizes = [2, 32], strides = [1, 1]} : vector<2x128xf32> to vector<2x32xf32>
    %50 = vector.extract_strided_slice %45 {offsets = [0, 96], sizes = [2, 32], strides = [1, 1]} : vector<2x128xf32> to vector<2x32xf32>
    %51 = arith.mulf %48, %29 : vector<2x32xf32>
    %52 = arith.mulf %47, %49 : vector<2x32xf32>
    %53 = arith.addf %51, %52 : vector<2x32xf32>
    %54 = math.tanh %53 : vector<2x32xf32>
    %55 = arith.mulf %50, %54 : vector<2x32xf32>
    %c2_i32 = arith.constant 2 : i32
    %56 = arith.truncf %55 : vector<2x32xf32> to vector<2x32xbf16>
    %cst_20 = arith.constant dense<0.000000e+00> : vector<2x128xf32>
    %57 = tpu.matmul %56, %4, %cst_20 {dimension_numbers = #tpu.dot_dimension_numbers<[1], [0], [0], [1], [0, 0, 1, 1], [], []>} : vector<2x32xbf16>, vector<32x128xbf16>, vector<2x128xf32> -> vector<2x128xf32>
    %58 = arith.index_cast %c2_i32 : i32 to index
    %c0_21 = arith.constant 0 : index
    %c0_22 = arith.constant 0 : index
    %59 = vector.load %arg2[%58, %c0_21, %c0_22] : memref<8x2x32xbf16, #tpu.memory_space<vmem>>, vector<1x2x32xbf16>
    %60 = vector.shape_cast %59 : vector<1x2x32xbf16> to vector<2x32xbf16>
    %cst_23 = arith.constant dense<0.000000e+00> : vector<2x128xf32>
    %61 = tpu.matmul %60, %3, %cst_23 {dimension_numbers = #tpu.dot_dimension_numbers<[1], [0], [0], [1], [0, 0, 1, 1], [], []>} : vector<2x32xbf16>, vector<32x128xbf16>, vector<2x128xf32> -> vector<2x128xf32>
    %62 = vector.broadcast %5 : vector<1x128xf32> to vector<2x128xf32>
    %63 = arith.addf %61, %62 : vector<2x128xf32>
    %64 = arith.addf %63, %57 : vector<2x128xf32>
    %65 = arith.negf %64 : vector<2x128xf32>
    %66 = math.exp %65 : vector<2x128xf32>
    %cst_24 = arith.constant 1.000000e+00 : f32
    %67 = vector.broadcast %cst_24 : f32 to vector<2x128xf32>
    %68 = arith.addf %67, %66 : vector<2x128xf32>
    %69 = arith.divf %67, %68 : vector<2x128xf32>
    %70 = math.tanh %64 : vector<2x128xf32>
    %71 = vector.extract_strided_slice %69 {offsets = [0, 0], sizes = [2, 32], strides = [1, 1]} : vector<2x128xf32> to vector<2x32xf32>
    %72 = vector.extract_strided_slice %69 {offsets = [0, 32], sizes = [2, 32], strides = [1, 1]} : vector<2x128xf32> to vector<2x32xf32>
    %73 = vector.extract_strided_slice %70 {offsets = [0, 64], sizes = [2, 32], strides = [1, 1]} : vector<2x128xf32> to vector<2x32xf32>
    %74 = vector.extract_strided_slice %69 {offsets = [0, 96], sizes = [2, 32], strides = [1, 1]} : vector<2x128xf32> to vector<2x32xf32>
    %75 = arith.mulf %72, %53 : vector<2x32xf32>
    %76 = arith.mulf %71, %73 : vector<2x32xf32>
    %77 = arith.addf %75, %76 : vector<2x32xf32>
    %78 = math.tanh %77 : vector<2x32xf32>
    %79 = arith.mulf %74, %78 : vector<2x32xf32>
    %c3_i32 = arith.constant 3 : i32
    %80 = arith.truncf %79 : vector<2x32xf32> to vector<2x32xbf16>
    %cst_25 = arith.constant dense<0.000000e+00> : vector<2x128xf32>
    %81 = tpu.matmul %80, %4, %cst_25 {dimension_numbers = #tpu.dot_dimension_numbers<[1], [0], [0], [1], [0, 0, 1, 1], [], []>} : vector<2x32xbf16>, vector<32x128xbf16>, vector<2x128xf32> -> vector<2x128xf32>
    %82 = arith.index_cast %c3_i32 : i32 to index
    %c0_26 = arith.constant 0 : index
    %c0_27 = arith.constant 0 : index
    %83 = vector.load %arg2[%82, %c0_26, %c0_27] : memref<8x2x32xbf16, #tpu.memory_space<vmem>>, vector<1x2x32xbf16>
    %84 = vector.shape_cast %83 : vector<1x2x32xbf16> to vector<2x32xbf16>
    %cst_28 = arith.constant dense<0.000000e+00> : vector<2x128xf32>
    %85 = tpu.matmul %84, %3, %cst_28 {dimension_numbers = #tpu.dot_dimension_numbers<[1], [0], [0], [1], [0, 0, 1, 1], [], []>} : vector<2x32xbf16>, vector<32x128xbf16>, vector<2x128xf32> -> vector<2x128xf32>
    %86 = vector.broadcast %5 : vector<1x128xf32> to vector<2x128xf32>
    %87 = arith.addf %85, %86 : vector<2x128xf32>
    %88 = arith.addf %87, %81 : vector<2x128xf32>
    %89 = arith.negf %88 : vector<2x128xf32>
    %90 = math.exp %89 : vector<2x128xf32>
    %cst_29 = arith.constant 1.000000e+00 : f32
    %91 = vector.broadcast %cst_29 : f32 to vector<2x128xf32>
    %92 = arith.addf %91, %90 : vector<2x128xf32>
    %93 = arith.divf %91, %92 : vector<2x128xf32>
    %94 = math.tanh %88 : vector<2x128xf32>
    %95 = vector.extract_strided_slice %93 {offsets = [0, 0], sizes = [2, 32], strides = [1, 1]} : vector<2x128xf32> to vector<2x32xf32>
    %96 = vector.extract_strided_slice %93 {offsets = [0, 32], sizes = [2, 32], strides = [1, 1]} : vector<2x128xf32> to vector<2x32xf32>
    %97 = vector.extract_strided_slice %94 {offsets = [0, 64], sizes = [2, 32], strides = [1, 1]} : vector<2x128xf32> to vector<2x32xf32>
    %98 = vector.extract_strided_slice %93 {offsets = [0, 96], sizes = [2, 32], strides = [1, 1]} : vector<2x128xf32> to vector<2x32xf32>
    %99 = arith.mulf %96, %77 : vector<2x32xf32>
    %100 = arith.mulf %95, %97 : vector<2x32xf32>
    %101 = arith.addf %99, %100 : vector<2x32xf32>
    %102 = math.tanh %101 : vector<2x32xf32>
    %103 = arith.mulf %98, %102 : vector<2x32xf32>
    %c4_i32 = arith.constant 4 : i32
    %104 = arith.truncf %103 : vector<2x32xf32> to vector<2x32xbf16>
    %cst_30 = arith.constant dense<0.000000e+00> : vector<2x128xf32>
    %105 = tpu.matmul %104, %4, %cst_30 {dimension_numbers = #tpu.dot_dimension_numbers<[1], [0], [0], [1], [0, 0, 1, 1], [], []>} : vector<2x32xbf16>, vector<32x128xbf16>, vector<2x128xf32> -> vector<2x128xf32>
    %106 = arith.index_cast %c4_i32 : i32 to index
    %c0_31 = arith.constant 0 : index
    %c0_32 = arith.constant 0 : index
    %107 = vector.load %arg2[%106, %c0_31, %c0_32] : memref<8x2x32xbf16, #tpu.memory_space<vmem>>, vector<1x2x32xbf16>
    %108 = vector.shape_cast %107 : vector<1x2x32xbf16> to vector<2x32xbf16>
    %cst_33 = arith.constant dense<0.000000e+00> : vector<2x128xf32>
    %109 = tpu.matmul %108, %3, %cst_33 {dimension_numbers = #tpu.dot_dimension_numbers<[1], [0], [0], [1], [0, 0, 1, 1], [], []>} : vector<2x32xbf16>, vector<32x128xbf16>, vector<2x128xf32> -> vector<2x128xf32>
    %110 = vector.broadcast %5 : vector<1x128xf32> to vector<2x128xf32>
    %111 = arith.addf %109, %110 : vector<2x128xf32>
    %112 = arith.addf %111, %105 : vector<2x128xf32>
    %113 = arith.negf %112 : vector<2x128xf32>
    %114 = math.exp %113 : vector<2x128xf32>
    %cst_34 = arith.constant 1.000000e+00 : f32
    %115 = vector.broadcast %cst_34 : f32 to vector<2x128xf32>
    %116 = arith.addf %115, %114 : vector<2x128xf32>
    %117 = arith.divf %115, %116 : vector<2x128xf32>
    %118 = math.tanh %112 : vector<2x128xf32>
    %119 = vector.extract_strided_slice %117 {offsets = [0, 0], sizes = [2, 32], strides = [1, 1]} : vector<2x128xf32> to vector<2x32xf32>
    %120 = vector.extract_strided_slice %117 {offsets = [0, 32], sizes = [2, 32], strides = [1, 1]} : vector<2x128xf32> to vector<2x32xf32>
    %121 = vector.extract_strided_slice %118 {offsets = [0, 64], sizes = [2, 32], strides = [1, 1]} : vector<2x128xf32> to vector<2x32xf32>
    %122 = vector.extract_strided_slice %117 {offsets = [0, 96], sizes = [2, 32], strides = [1, 1]} : vector<2x128xf32> to vector<2x32xf32>
    %123 = arith.mulf %120, %101 : vector<2x32xf32>
    %124 = arith.mulf %119, %121 : vector<2x32xf32>
    %125 = arith.addf %123, %124 : vector<2x32xf32>
    %126 = math.tanh %125 : vector<2x32xf32>
    %127 = arith.mulf %122, %126 : vector<2x32xf32>
    %c5_i32 = arith.constant 5 : i32
    %128 = arith.truncf %127 : vector<2x32xf32> to vector<2x32xbf16>
    %cst_35 = arith.constant dense<0.000000e+00> : vector<2x128xf32>
    %129 = tpu.matmul %128, %4, %cst_35 {dimension_numbers = #tpu.dot_dimension_numbers<[1], [0], [0], [1], [0, 0, 1, 1], [], []>} : vector<2x32xbf16>, vector<32x128xbf16>, vector<2x128xf32> -> vector<2x128xf32>
    %130 = arith.index_cast %c5_i32 : i32 to index
    %c0_36 = arith.constant 0 : index
    %c0_37 = arith.constant 0 : index
    %131 = vector.load %arg2[%130, %c0_36, %c0_37] : memref<8x2x32xbf16, #tpu.memory_space<vmem>>, vector<1x2x32xbf16>
    %132 = vector.shape_cast %131 : vector<1x2x32xbf16> to vector<2x32xbf16>
    %cst_38 = arith.constant dense<0.000000e+00> : vector<2x128xf32>
    %133 = tpu.matmul %132, %3, %cst_38 {dimension_numbers = #tpu.dot_dimension_numbers<[1], [0], [0], [1], [0, 0, 1, 1], [], []>} : vector<2x32xbf16>, vector<32x128xbf16>, vector<2x128xf32> -> vector<2x128xf32>
    %134 = vector.broadcast %5 : vector<1x128xf32> to vector<2x128xf32>
    %135 = arith.addf %133, %134 : vector<2x128xf32>
    %136 = arith.addf %135, %129 : vector<2x128xf32>
    %137 = arith.negf %136 : vector<2x128xf32>
    %138 = math.exp %137 : vector<2x128xf32>
    %cst_39 = arith.constant 1.000000e+00 : f32
    %139 = vector.broadcast %cst_39 : f32 to vector<2x128xf32>
    %140 = arith.addf %139, %138 : vector<2x128xf32>
    %141 = arith.divf %139, %140 : vector<2x128xf32>
    %142 = math.tanh %136 : vector<2x128xf32>
    %143 = vector.extract_strided_slice %141 {offsets = [0, 0], sizes = [2, 32], strides = [1, 1]} : vector<2x128xf32> to vector<2x32xf32>
    %144 = vector.extract_strided_slice %141 {offsets = [0, 32], sizes = [2, 32], strides = [1, 1]} : vector<2x128xf32> to vector<2x32xf32>
    %145 = vector.extract_strided_slice %142 {offsets = [0, 64], sizes = [2, 32], strides = [1, 1]} : vector<2x128xf32> to vector<2x32xf32>
    %146 = vector.extract_strided_slice %141 {offsets = [0, 96], sizes = [2, 32], strides = [1, 1]} : vector<2x128xf32> to vector<2x32xf32>
    %147 = arith.mulf %144, %125 : vector<2x32xf32>
    %148 = arith.mulf %143, %145 : vector<2x32xf32>
    %149 = arith.addf %147, %148 : vector<2x32xf32>
    %150 = math.tanh %149 : vector<2x32xf32>
    %151 = arith.mulf %146, %150 : vector<2x32xf32>
    %c6_i32 = arith.constant 6 : i32
    %152 = arith.truncf %151 : vector<2x32xf32> to vector<2x32xbf16>
    %cst_40 = arith.constant dense<0.000000e+00> : vector<2x128xf32>
    %153 = tpu.matmul %152, %4, %cst_40 {dimension_numbers = #tpu.dot_dimension_numbers<[1], [0], [0], [1], [0, 0, 1, 1], [], []>} : vector<2x32xbf16>, vector<32x128xbf16>, vector<2x128xf32> -> vector<2x128xf32>
    %154 = arith.index_cast %c6_i32 : i32 to index
    %c0_41 = arith.constant 0 : index
    %c0_42 = arith.constant 0 : index
    %155 = vector.load %arg2[%154, %c0_41, %c0_42] : memref<8x2x32xbf16, #tpu.memory_space<vmem>>, vector<1x2x32xbf16>
    %156 = vector.shape_cast %155 : vector<1x2x32xbf16> to vector<2x32xbf16>
    %cst_43 = arith.constant dense<0.000000e+00> : vector<2x128xf32>
    %157 = tpu.matmul %156, %3, %cst_43 {dimension_numbers = #tpu.dot_dimension_numbers<[1], [0], [0], [1], [0, 0, 1, 1], [], []>} : vector<2x32xbf16>, vector<32x128xbf16>, vector<2x128xf32> -> vector<2x128xf32>
    %158 = vector.broadcast %5 : vector<1x128xf32> to vector<2x128xf32>
    %159 = arith.addf %157, %158 : vector<2x128xf32>
    %160 = arith.addf %159, %153 : vector<2x128xf32>
    %161 = arith.negf %160 : vector<2x128xf32>
    %162 = math.exp %161 : vector<2x128xf32>
    %cst_44 = arith.constant 1.000000e+00 : f32
    %163 = vector.broadcast %cst_44 : f32 to vector<2x128xf32>
    %164 = arith.addf %163, %162 : vector<2x128xf32>
    %165 = arith.divf %163, %164 : vector<2x128xf32>
    %166 = math.tanh %160 : vector<2x128xf32>
    %167 = vector.extract_strided_slice %165 {offsets = [0, 0], sizes = [2, 32], strides = [1, 1]} : vector<2x128xf32> to vector<2x32xf32>
    %168 = vector.extract_strided_slice %165 {offsets = [0, 32], sizes = [2, 32], strides = [1, 1]} : vector<2x128xf32> to vector<2x32xf32>
    %169 = vector.extract_strided_slice %166 {offsets = [0, 64], sizes = [2, 32], strides = [1, 1]} : vector<2x128xf32> to vector<2x32xf32>
    %170 = vector.extract_strided_slice %165 {offsets = [0, 96], sizes = [2, 32], strides = [1, 1]} : vector<2x128xf32> to vector<2x32xf32>
    %171 = arith.mulf %168, %149 : vector<2x32xf32>
    %172 = arith.mulf %167, %169 : vector<2x32xf32>
    %173 = arith.addf %171, %172 : vector<2x32xf32>
    %174 = math.tanh %173 : vector<2x32xf32>
    %175 = arith.mulf %170, %174 : vector<2x32xf32>
    %c7_i32 = arith.constant 7 : i32
    %176 = arith.truncf %175 : vector<2x32xf32> to vector<2x32xbf16>
    %cst_45 = arith.constant dense<0.000000e+00> : vector<2x128xf32>
    %177 = tpu.matmul %176, %4, %cst_45 {dimension_numbers = #tpu.dot_dimension_numbers<[1], [0], [0], [1], [0, 0, 1, 1], [], []>} : vector<2x32xbf16>, vector<32x128xbf16>, vector<2x128xf32> -> vector<2x128xf32>
    %178 = arith.index_cast %c7_i32 : i32 to index
    %c0_46 = arith.constant 0 : index
    %c0_47 = arith.constant 0 : index
    %179 = vector.load %arg2[%178, %c0_46, %c0_47] : memref<8x2x32xbf16, #tpu.memory_space<vmem>>, vector<1x2x32xbf16>
    %180 = vector.shape_cast %179 : vector<1x2x32xbf16> to vector<2x32xbf16>
    %cst_48 = arith.constant dense<0.000000e+00> : vector<2x128xf32>
    %181 = tpu.matmul %180, %3, %cst_48 {dimension_numbers = #tpu.dot_dimension_numbers<[1], [0], [0], [1], [0, 0, 1, 1], [], []>} : vector<2x32xbf16>, vector<32x128xbf16>, vector<2x128xf32> -> vector<2x128xf32>
    %182 = vector.broadcast %5 : vector<1x128xf32> to vector<2x128xf32>
    %183 = arith.addf %181, %182 : vector<2x128xf32>
    %184 = arith.addf %183, %177 : vector<2x128xf32>
    %185 = arith.negf %184 : vector<2x128xf32>
    %186 = math.exp %185 : vector<2x128xf32>
    %cst_49 = arith.constant 1.000000e+00 : f32
    %187 = vector.broadcast %cst_49 : f32 to vector<2x128xf32>
    %188 = arith.addf %187, %186 : vector<2x128xf32>
    %189 = arith.divf %187, %188 : vector<2x128xf32>
    %190 = math.tanh %184 : vector<2x128xf32>
    %191 = vector.extract_strided_slice %189 {offsets = [0, 0], sizes = [2, 32], strides = [1, 1]} : vector<2x128xf32> to vector<2x32xf32>
    %192 = vector.extract_strided_slice %189 {offsets = [0, 32], sizes = [2, 32], strides = [1, 1]} : vector<2x128xf32> to vector<2x32xf32>
    %193 = vector.extract_strided_slice %190 {offsets = [0, 64], sizes = [2, 32], strides = [1, 1]} : vector<2x128xf32> to vector<2x32xf32>
    %194 = vector.extract_strided_slice %189 {offsets = [0, 96], sizes = [2, 32], strides = [1, 1]} : vector<2x128xf32> to vector<2x32xf32>
    %195 = arith.mulf %192, %173 : vector<2x32xf32>
    %196 = arith.mulf %191, %193 : vector<2x32xf32>
    %197 = arith.addf %195, %196 : vector<2x32xf32>
    %198 = math.tanh %197 : vector<2x32xf32>
    %199 = arith.mulf %194, %198 : vector<2x32xf32>
    %c8_i32 = arith.constant 8 : i32
    %c0_50 = arith.constant 0 : index
    %c0_51 = arith.constant 0 : index
    %200 = vector.load %arg9[%c0_50, %c0_51] : memref<2x32xf32, #tpu.memory_space<vmem>>, vector<2x32xf32>
    tpu.vector_store %arg9[%c0_50, %c0_51], %199 {strides = array<i32>} : memref<2x32xf32, #tpu.memory_space<vmem>>, vector<2x32xf32>,
    %c0_52 = arith.constant 0 : index
    %c0_53 = arith.constant 0 : index
    %201 = vector.load %arg10[%c0_52, %c0_53] : memref<2x32xf32, #tpu.memory_space<vmem>>, vector<2x32xf32>
    tpu.vector_store %arg10[%c0_52, %c0_53], %197 {strides = array<i32>} : memref<2x32xf32, #tpu.memory_space<vmem>>, vector<2x32xf32>,
    %c0_i32_54 = arith.constant 0 : i32
    %202 = arith.cmpi eq, %arg1, %c0_i32_54 : i32
    %203 = arith.extui %202 : i1 to i32
    %c0_i32_55 = arith.constant 0 : i32
    %204 = arith.cmpi ne, %203, %c0_i32_55 : i32
    scf.if %204 {
      %c0_56 = arith.constant 0 : index
      %c0_57 = arith.constant 0 : index
      %205 = vector.load %arg6[%c0_56, %c0_57] : memref<32x1xf32, #tpu.memory_space<vmem>>, vector<32x1xf32>
      %cst_58 = arith.constant dense<0.000000e+00> : vector<2x1xf32>
      %206 = tpu.matmul %199, %205, %cst_58 {dimension_numbers = #tpu.dot_dimension_numbers<[1], [0], [0], [1], [0, 0, 1, 1], [], []>} : vector<2x32xf32>, vector<32x1xf32>, vector<2x1xf32> -> vector<2x1xf32>
      %c0_59 = arith.constant 0 : index
      %c0_60 = arith.constant 0 : index
      %207 = vector.load %arg7[%c0_59, %c0_60] : memref<1x1xf32, #tpu.memory_space<vmem>>, vector<1x1xf32>
      %208 = vector.broadcast %207 : vector<1x1xf32> to vector<2x1xf32>
      %209 = arith.addf %206, %208 : vector<2x1xf32>
      %c0_61 = arith.constant 0 : index
      %c0_62 = arith.constant 0 : index
      %210 = vector.load %arg8[%c0_61, %c0_62] : memref<2x1xf32, #tpu.memory_space<vmem>>, vector<2x1xf32>
      tpu.vector_store %arg8[%c0_61, %c0_62], %209 {strides = array<i32>} : memref<2x1xf32, #tpu.memory_space<vmem>>, vector<2x1xf32>,
    } else {
    }
    return
  }
  func.func @transform_0(%arg0: i32, %arg1: i32) -> (i32, i32, i32) {
    %c0_i32 = arith.constant 0 : i32
    %c0_i32_0 = arith.constant 0 : i32
    return %arg1, %arg0, %c0_i32 : i32, i32, i32
  }
  func.func @transform_1(%arg0: i32, %arg1: i32) -> (i32, i32) {
    %c0_i32 = arith.constant 0 : i32
    %c0_i32_0 = arith.constant 0 : i32
    %c0_i32_1 = arith.constant 0 : i32
    return %c0_i32, %c0_i32_0 : i32, i32
  }
  func.func @transform_2(%arg0: i32, %arg1: i32) -> (i32, i32) {
    %c0_i32 = arith.constant 0 : i32
    %c0_i32_0 = arith.constant 0 : i32
    %c0_i32_1 = arith.constant 0 : i32
    return %c0_i32, %c0_i32_0 : i32, i32
  }
  func.func @transform_3(%arg0: i32, %arg1: i32) -> (i32, i32) {
    %c0_i32 = arith.constant 0 : i32
    %c0_i32_0 = arith.constant 0 : i32
    %c0_i32_1 = arith.constant 0 : i32
    return %c0_i32, %c0_i32_0 : i32, i32
  }
  func.func @transform_4(%arg0: i32, %arg1: i32) -> (i32, i32) {
    %c0_i32 = arith.constant 0 : i32
    %c0_i32_0 = arith.constant 0 : i32
    %c0_i32_1 = arith.constant 0 : i32
    return %c0_i32, %c0_i32_0 : i32, i32
  }
  func.func @transform_5(%arg0: i32, %arg1: i32) -> (i32, i32) {
    %c0_i32 = arith.constant 0 : i32
    %c0_i32_0 = arith.constant 0 : i32
    %c0_i32_1 = arith.constant 0 : i32
    return %c0_i32, %c0_i32_0 : i32, i32
  }
  func.func @transform_6(%arg0: i32, %arg1: i32) -> (i32, i32) {
    %c0_i32 = arith.constant 0 : i32
    %c0_i32_0 = arith.constant 0 : i32
    return %arg0, %c0_i32 : i32, i32
  }
}

</mosaic_0001>

<bundles_post_ra>
// kernel: lstm_forward.3
= control target key start
LH: loop header
LB: loop body
LE: loop exit
PB: predicated region body
PF: predicated region fallthrough
CT: control target
= control target key end

     0   :  { %vm30_vm0 = vcmask 254976   ;;  %v1417_v0 = vmov 0.0   ;;  %vm1418_vm1 = vmmov 0   ;;  %vm57_vm2 = vcmask 261120   ;;  %s1419_s7 = smov 64   ;;  %s1420_s8 = smov 32   ;;  %s1690_s2 = inlined_call_operand.vmem [shape: bf16[32,128], index: 2, kind: input, shape index: {}]   ;;  %s1691_s1 = inlined_call_operand.vmem [shape: bf16[32,128], index: 1, kind: input, shape index: {}]   ;;  %s1692_s0 = inlined_call_operand.vmem [shape: bf16[8,2,32], index: 0, kind: input, shape index: {}]   ;;  %s1693_s3 = inlined_call_operand.vmem [shape: f32[1,128], index: 3, kind: input, shape index: {}]   ;;  %s1694_s4 = inlined_call_operand.vmem [shape: f32[32,1], index: 4, kind: input, shape index: {}]   ;;  %s1695_s5 = inlined_call_operand.<no memory space> [shape: f32[1,1], index: 5, kind: input, shape index: {}]   ;;  %s1696_s6 = inlined_call_operand.vmem [shape: f32[2,1], index: 6, kind: output, shape index: {}]  }
   0x1   :  { %1205 = vmatprep.subr.bf16.mxu0 %v1417_v0  ;;  %1213 = vmatprep.subr.bf16.mxu1 %v1417_v0  ;;  %v1462_v1 = vld [vmem:[%s1690_s2 + $0x8] sm:$0xff]   ;;  %31 = vst.msk [vmem:[#allocation2] sm:$0x3] %vm30_vm0, %v1417_v0  ;;  %32 = vst.msk [vmem:[#allocation3] sm:$0x3] %vm30_vm0, %v1417_v0  ;;  %v1481_v3 = vld [vmem:[%s1690_s2] sm:$0xff]  }
   0x2   :  { %v1471_v2 = vld [vmem:[%s1691_s1 + $0x8] sm:$0xff]   ;;  %1209 = vmatprep.mubr.msk.bf16.mxu0 %vm1418_vm1, %v1417_v0  ;;  %1217 = vmatprep.mubr.msk.bf16.mxu1 %vm1418_vm1, %v1417_v0  ;;  %v1488_v4 = vld [vmem:[%s1691_s1] sm:$0xff]   ;;  %s1421_s29 = smov 96   ;;  %vm1108_vm3 = vcmask 1024  }
   0x3   :  { %1206 = vmatpush3.bf16.msra.mxu0 %v1462_v1  ;;  %1214 = vmatpush3.bf16.msra.mxu1 %v1471_v2  ;;  %v101_v6 = vld [vmem:[%s1692_s0] sm:$0x1]  ;;  %v1123_v31 = vld [vmem:[%s1692_s0 + $0x1] sm:$0x1]  ;;  %v1127_v57 = vld [vmem:[%s1692_s0 + $0x2] sm:$0x1] }
   0x4   :  { %1207 = vmatprep.subr.bf16.mxu0 %v1417_v0  ;;  %1215 = vmatprep.subr.bf16.mxu1 %v1417_v0  ;;  %v1515_v8 = vld [vmem:[%s1693_s3] ss:$0 sm:$0xff] }
   0x7   :  { %1208 = vmatpush3.bf16.msra.mxu0 %v1481_v3  ;;  %1216 = vmatpush3.bf16.msra.mxu1 %v1488_v4 }
   0x8   :  { %v42_v5 = vld [vmem:[#allocation2] sm:$0x3]  ;;  %1221 = vmatprep.subr.bf16.mxu0 %v1417_v0  ;;  %1229 = vmatprep.subr.bf16.mxu1 %v1417_v0  ;;  %v43_v20 = vld [vmem:[#allocation3] sm:$0x3] }
   0x9   :  { %v44_v7 = vpack.c.bf16 %v42_v5, %v42_v5 }
   0xa   :  { %1218 = vmatmul.mubr.msk.bf16.vlgmr.msra.gmra.mxu1 %vm57_vm2, %v101_v6 }
   0xb   :  { %1210 = vmatmul.mubr.msk.bf16.vlgmr.msra.gmra.mxu0 %vm57_vm2, %v44_v7  ;;  %1230 = vmatpush3.bf16.msra.mxu1 %v1471_v2 }
   0xc   :  { %1233 = vmatprep.mubr.msk.bf16.mxu1 %vm1418_vm1, %v1417_v0  ;;  %1231 = vmatprep.subr.bf16.mxu1 %v1417_v0 }
   0xd   :  { %1222 = vmatpush3.bf16.msra.mxu0 %v1462_v1  ;;  %1225 = vmatprep.mubr.msk.bf16.mxu0 %vm1418_vm1, %v1417_v0 }
   0xe   :  { %1223 = vmatprep.subr.bf16.mxu0 %v1417_v0 }
   0xf   :  { %1232 = vmatpush3.bf16.msra.mxu1 %v1488_v4 }
  0x10   :  { %1245 = vmatprep.subr.bf16.mxu1 %v1417_v0 }
  0x11   :  { %1224 = vmatpush3.bf16.msra.mxu0 %v1481_v3 }
  0x12   :  { %1237 = vmatprep.subr.bf16.mxu0 %v1417_v0  ;;  %1234 = vmatmul.mubr.msk.bf16.vlgmr.msra.gmra.mxu1 %vm57_vm2, %v1123_v31 }
  0x13   :  { %1246 = vmatpush3.bf16.msra.mxu1 %v1471_v2  ;;  %1249 = vmatprep.mubr.msk.bf16.mxu1 %vm1418_vm1, %v1417_v0 }
  0x14   :  { %1247 = vmatprep.subr.bf16.mxu1 %v1417_v0 }
  0x17   :  { %1248 = vmatpush3.bf16.msra.mxu1 %v1488_v4 }
  0x18   :  { %1261 = vmatprep.subr.bf16.mxu1 %v1417_v0 }
  0x1a   :  { %1250 = vmatmul.mubr.msk.bf16.vlgmr.msra.gmra.mxu1 %vm57_vm2, %v1127_v57 }
  0x1b   :  { %1262 = vmatpush3.bf16.msra.mxu1 %v1471_v2  ;;  %1265 = vmatprep.mubr.msk.bf16.mxu1 %vm1418_vm1, %v1417_v0 }
  0x1c   :  { %1263 = vmatprep.subr.bf16.mxu1 %v1417_v0 }
  0x1f   :  { %1264 = vmatpush3.bf16.msra.mxu1 %v1488_v4 }
  0x20   :  { %1277 = vmatprep.subr.bf16.mxu1 %v1417_v0 }
  0xca   :  { %v157_v10 = vpop.f32.mrf.mxu1 }
  0xcb   :  { %v95_v9 = vpop.f32.mrf.mxu0  ;;  %v158_v11 = vadd.f32 %v1515_v8, %v157_v10 }
  0xcc   :  { %v1219_v13 = vpop.f32.mrf.mxu1 }
  0xcd   :  { %v1211_v12 = vpop.f32.mrf.mxu0  ;;  %v163_v14 = vadd.f32 %v158_v11, %v95_v9 }
  0xce   :  { %v160_v16 = vpop.f32.mrf.mxu1 }
  0xcf   :  { %v98_v15 = vpop.f32.mrf.mxu0  ;;  %1353 = vtanh.f32 %v163_v14  ;;  %v1121_v21 = vmul.f32 -1.442695, %v163_v14 }
  0xd0   :  { %v1220_v18 = vpop.f32.mrf.mxu1 }
  0xd1   :  { %v1212_v17 = vpop.f32.mrf.mxu0  ;;  %1355 = vpow2.f32 %v1121_v21 }
  0xd2   :  { %v278_v36 = vpop.f32.mrf.mxu1 }
  0xd3   :  { %v279_v41 = vadd.f32 %v1515_v8, %v278_v36 }
  0xd4   :  { %v1235_v37 = vpop.f32.mrf.mxu1 }
  0xd6   :  { %v281_v38 = vpop.f32.mrf.mxu1 }
  0xd8   :  { %v1236_v39 = vpop.f32.mrf.mxu1 }
  0xda   :  { %v395_v62 = vpop.f32.mrf.mxu1 }
  0xdb   :  { %v396_v9 = vadd.f32 %v1515_v8, %v395_v62 }
  0xdc   :  { %v1354_v19 = vpop.eup %1353  ;;  %v1251_v63 = vpop.f32.mrf.mxu1 }
  0xdd   :  { %177 = vrot.lane.b32.xlu0 %v1354_v19, %s1419_s7 }
  0xde   :  { %v1356_v22 = vpop.eup %1355  ;;  %v398_v5 = vpop.f32.mrf.mxu1 }
  0xdf   :  { %v167_v23 = vadd.f32 1.0, %v1356_v22 }
  0xe0   :  { %v1252_v6 = vpop.f32.mrf.mxu1 }
  0xe1   :  { %172 = vrot.lane.b32.xlu0 %v43_v20, %s1420_s8  ;;  %1357 = vrcp.f32 %v167_v23 }
  0xee   :  { %v1358_v24 = vpop.eup %1357 }
 0x14f   :  { %v178_v25 = vpop.permute.xlu0 %177 }
 0x150   :  { %v180_v26 = vmul.f32 %v1358_v24, %v178_v25  ;;  %v1131_v25 = vld [vmem:[%s1692_s0 + $0x3] sm:$0x1] }
 0x151   :  { %1266 = vmatmul.mubr.msk.bf16.vlgmr.msra.gmra.mxu1 %vm57_vm2, %v1131_v25 }
 0x152   :  { %182 = vrot.lane.b32.xlu1 %v180_v26, %s1420_s8  ;;  %1278 = vmatpush3.bf16.msra.mxu1 %v1471_v2 }
 0x153   :  { %v173_v27 = vpop.permute.xlu0 %172  ;;  %1281 = vmatprep.mubr.msk.bf16.mxu1 %vm1418_vm1, %v1417_v0  ;;  %1279 = vmatprep.subr.bf16.mxu1 %v1417_v0 }
 0x154   :  { %v175_v28 = vmul.f32 %v1358_v24, %v173_v27 }
 0x156   :  { %1280 = vmatpush3.bf16.msra.mxu1 %v1488_v4 }
 0x157   :  { %1293 = vmatprep.subr.bf16.mxu1 %v1417_v0 }
 0x1c4   :  { %v183_v29 = vpop.permute.xlu1 %182 }
 0x1c5   :  { %v185_v30 = vadd.f32 %v183_v29, %v175_v28 }
 0x1c7   :  { %1359 = vtanh.f32 %v185_v30 }
 0x1d4   :  { %v1360_v32 = vpop.eup %1359 }
 0x1d5   :  { %188 = vrot.lane.b32.xlu1 %v1360_v32, %s1419_s7 }
 0x247   :  { %v189_v33 = vpop.permute.xlu1 %188 }
 0x248   :  { %v191_v34 = vmul.f32 %v1358_v24, %v189_v33 }
 0x24a   :  { %v192_v35 = vpack.c.bf16 %v191_v34, %v191_v34 }
 0x24c   :  { %194 = vrot.lane.b32.xlu0 %v192_v35, %s1420_s8 }
 0x2be   :  { %v195_v40 = vpop.permute.xlu0 %194 }
 0x2bf   :  { %1226 = vmatmul.mubr.msk.bf16.vlgmr.msra.gmra.mxu0 %vm57_vm2, %v195_v40 }
 0x2c0   :  { %1238 = vmatpush3.bf16.msra.mxu0 %v1462_v1  ;;  %1241 = vmatprep.mubr.msk.bf16.mxu0 %vm1418_vm1, %v1417_v0 }
 0x2c1   :  { %1239 = vmatprep.subr.bf16.mxu0 %v1417_v0 }
 0x2c4   :  { %1240 = vmatpush3.bf16.msra.mxu0 %v1481_v3 }
 0x2c5   :  { %1253 = vmatprep.subr.bf16.mxu0 %v1417_v0 }
 0x37f   :  { %v233_v42 = vpop.f32.mrf.mxu0 }
 0x380   :  { %v284_v43 = vadd.f32 %v279_v41, %v233_v42 }
 0x381   :  { %v1227_v44 = vpop.f32.mrf.mxu0 }
 0x382   :  { %1361 = vtanh.f32 %v284_v43  ;;  %v1125_v48 = vmul.f32 -1.442695, %v284_v43 }
 0x383   :  { %v236_v45 = vpop.f32.mrf.mxu0 }
 0x384   :  { %1363 = vpow2.f32 %v1125_v48 }
 0x385   :  { %v1228_v46 = vpop.f32.mrf.mxu0 }
 0x38f   :  { %v1362_v47 = vpop.eup %1361 }
 0x390   :  { %294 = vrot.lane.b32.xlu1 %v1362_v47, %s1419_s7 }
 0x391   :  { %v1364_v49 = vpop.eup %1363 }
 0x392   :  { %v288_v50 = vadd.f32 1.0, %v1364_v49 }
 0x394   :  { %1365 = vrcp.f32 %v288_v50 }
 0x3a1   :  { %v1366_v51 = vpop.eup %1365 }
 0x3a2   :  { %v292_v54 = vmul.f32 %v1366_v51, %v185_v30  ;;  %v512_v30 = vpop.f32.mrf.mxu1 }
 0x3a3   :  { %v513_v35 = vadd.f32 %v1515_v8, %v512_v30 }
 0x3a4   :  { %v1267_v31 = vpop.f32.mrf.mxu1 }
 0x3a6   :  { %v515_v32 = vpop.f32.mrf.mxu1 }
 0x3a8   :  { %v1268_v33 = vpop.f32.mrf.mxu1 }
 0x402   :  { %v295_v52 = vpop.permute.xlu1 %294 }
 0x403   :  { %v297_v53 = vmul.f32 %v1366_v51, %v295_v52 }
 0x405   :  { %299 = vrot.lane.b32.xlu0 %v297_v53, %s1420_s8 }
 0x477   :  { %v300_v55 = vpop.permute.xlu0 %299 }
 0x478   :  { %v302_v56 = vadd.f32 %v300_v55, %v292_v54 }
 0x47a   :  { %1367 = vtanh.f32 %v302_v56 }
 0x487   :  { %v1368_v58 = vpop.eup %1367 }
 0x488   :  { %305 = vrot.lane.b32.xlu1 %v1368_v58, %s1419_s7 }
 0x4fa   :  { %v306_v59 = vpop.permute.xlu1 %305 }
 0x4fb   :  { %v308_v60 = vmul.f32 %v1366_v51, %v306_v59  ;;  %v1135_v51 = vld [vmem:[%s1692_s0 + $0x4] sm:$0x1] }
 0x4fc   :  { %1282 = vmatmul.mubr.msk.bf16.vlgmr.msra.gmra.mxu1 %vm57_vm2, %v1135_v51 }
 0x4fd   :  { %v309_v61 = vpack.c.bf16 %v308_v60, %v308_v60  ;;  %1294 = vmatpush3.bf16.msra.mxu1 %v1471_v2  ;;  %1297 = vmatprep.mubr.msk.bf16.mxu1 %vm1418_vm1, %v1417_v0 }
 0x4fe   :  { %1295 = vmatprep.subr.bf16.mxu1 %v1417_v0 }
 0x4ff   :  { %311 = vrot.lane.b32.xlu0 %v309_v61, %s1420_s8 }
 0x501   :  { %1296 = vmatpush3.bf16.msra.mxu1 %v1488_v4 }
 0x502   :  { %1309 = vmatprep.subr.bf16.mxu1 %v1417_v0 }
 0x571   :  { %v312_v7 = vpop.permute.xlu0 %311 }
 0x572   :  { %1242 = vmatmul.mubr.msk.bf16.vlgmr.msra.gmra.mxu0 %vm57_vm2, %v312_v7 }
 0x573   :  { %1254 = vmatpush3.bf16.msra.mxu0 %v1462_v1  ;;  %1257 = vmatprep.mubr.msk.bf16.mxu0 %vm1418_vm1, %v1417_v0 }
 0x574   :  { %1255 = vmatprep.subr.bf16.mxu0 %v1417_v0 }
 0x577   :  { %1256 = vmatpush3.bf16.msra.mxu0 %v1481_v3 }
 0x578   :  { %1269 = vmatprep.subr.bf16.mxu0 %v1417_v0 }
 0x632   :  { %v350_v10 = vpop.f32.mrf.mxu0 }
 0x633   :  { %v401_v11 = vadd.f32 %v396_v9, %v350_v10 }
 0x634   :  { %v1243_v12 = vpop.f32.mrf.mxu0 }
 0x635   :  { %1369 = vtanh.f32 %v401_v11  ;;  %v1129_v16 = vmul.f32 -1.442695, %v401_v11 }
 0x636   :  { %v353_v13 = vpop.f32.mrf.mxu0 }
 0x637   :  { %1371 = vpow2.f32 %v1129_v16 }
 0x638   :  { %v1244_v14 = vpop.f32.mrf.mxu0 }
 0x642   :  { %v1370_v15 = vpop.eup %1369 }
 0x643   :  { %411 = vrot.lane.b32.xlu1 %v1370_v15, %s1419_s7 }
 0x644   :  { %v1372_v17 = vpop.eup %1371 }
 0x645   :  { %v405_v18 = vadd.f32 1.0, %v1372_v17 }
 0x647   :  { %1373 = vrcp.f32 %v405_v18 }
 0x654   :  { %v1374_v19 = vpop.eup %1373 }
 0x655   :  { %v409_v22 = vmul.f32 %v1374_v19, %v302_v56  ;;  %v629_v56 = vpop.f32.mrf.mxu1 }
 0x656   :  { %v630_v61 = vadd.f32 %v1515_v8, %v629_v56 }
 0x657   :  { %v1283_v57 = vpop.f32.mrf.mxu1 }
 0x659   :  { %v632_v58 = vpop.f32.mrf.mxu1 }
 0x65b   :  { %v1284_v59 = vpop.f32.mrf.mxu1 }
 0x6b5   :  { %v412_v20 = vpop.permute.xlu1 %411 }
 0x6b6   :  { %v414_v21 = vmul.f32 %v1374_v19, %v412_v20 }
 0x6b8   :  { %416 = vrot.lane.b32.xlu0 %v414_v21, %s1420_s8 }
 0x72a   :  { %v417_v23 = vpop.permute.xlu0 %416 }
 0x72b   :  { %v419_v24 = vadd.f32 %v417_v23, %v409_v22 }
 0x72d   :  { %1375 = vtanh.f32 %v419_v24 }
 0x73a   :  { %v1376_v26 = vpop.eup %1375 }
 0x73b   :  { %422 = vrot.lane.b32.xlu1 %v1376_v26, %s1419_s7 }
 0x7ad   :  { %v423_v27 = vpop.permute.xlu1 %422 }
 0x7ae   :  { %v425_v28 = vmul.f32 %v1374_v19, %v423_v27  ;;  %v1139_v19 = vld [vmem:[%s1692_s0 + $0x5] sm:$0x1] }
 0x7af   :  { %1298 = vmatmul.mubr.msk.bf16.vlgmr.msra.gmra.mxu1 %vm57_vm2, %v1139_v19 }
 0x7b0   :  { %v426_v29 = vpack.c.bf16 %v425_v28, %v425_v28  ;;  %1310 = vmatpush3.bf16.msra.mxu1 %v1471_v2  ;;  %1313 = vmatprep.mubr.msk.bf16.mxu1 %vm1418_vm1, %v1417_v0 }
 0x7b1   :  { %1311 = vmatprep.subr.bf16.mxu1 %v1417_v0 }
 0x7b2   :  { %428 = vrot.lane.b32.xlu0 %v426_v29, %s1420_s8 }
 0x7b4   :  { %1312 = vmatpush3.bf16.msra.mxu1 %v1488_v4 }
 0x7b5   :  { %1325 = vmatprep.subr.bf16.mxu1 %v1417_v0 }
 0x824   :  { %v429_v34 = vpop.permute.xlu0 %428 }
 0x825   :  { %1258 = vmatmul.mubr.msk.bf16.vlgmr.msra.gmra.mxu0 %vm57_vm2, %v429_v34 }
 0x826   :  { %1270 = vmatpush3.bf16.msra.mxu0 %v1462_v1  ;;  %1273 = vmatprep.mubr.msk.bf16.mxu0 %vm1418_vm1, %v1417_v0 }
 0x827   :  { %1271 = vmatprep.subr.bf16.mxu0 %v1417_v0 }
 0x82a   :  { %1272 = vmatpush3.bf16.msra.mxu0 %v1481_v3 }
 0x82b   :  { %1285 = vmatprep.subr.bf16.mxu0 %v1417_v0 }
 0x8e5   :  { %v467_v36 = vpop.f32.mrf.mxu0 }
 0x8e6   :  { %v518_v37 = vadd.f32 %v513_v35, %v467_v36 }
 0x8e7   :  { %v1259_v38 = vpop.f32.mrf.mxu0 }
 0x8e8   :  { %1377 = vtanh.f32 %v518_v37  ;;  %v1133_v42 = vmul.f32 -1.442695, %v518_v37 }
 0x8e9   :  { %v470_v39 = vpop.f32.mrf.mxu0 }
 0x8ea   :  { %1379 = vpow2.f32 %v1133_v42 }
 0x8eb   :  { %v1260_v40 = vpop.f32.mrf.mxu0 }
 0x8f5   :  { %v1378_v41 = vpop.eup %1377 }
 0x8f6   :  { %528 = vrot.lane.b32.xlu1 %v1378_v41, %s1419_s7 }
 0x8f7   :  { %v1380_v43 = vpop.eup %1379 }
 0x8f8   :  { %v522_v44 = vadd.f32 1.0, %v1380_v43 }
 0x8fa   :  { %1381 = vrcp.f32 %v522_v44 }
 0x907   :  { %v1382_v45 = vpop.eup %1381 }
 0x908   :  { %v526_v48 = vmul.f32 %v1382_v45, %v419_v24  ;;  %v746_v24 = vpop.f32.mrf.mxu1 }
 0x909   :  { %v747_v29 = vadd.f32 %v1515_v8, %v746_v24 }
 0x90a   :  { %v1299_v25 = vpop.f32.mrf.mxu1 }
 0x90c   :  { %v749_v26 = vpop.f32.mrf.mxu1 }
 0x90e   :  { %v1300_v27 = vpop.f32.mrf.mxu1 }
 0x968   :  { %v529_v46 = vpop.permute.xlu1 %528 }
 0x969   :  { %v531_v47 = vmul.f32 %v1382_v45, %v529_v46 }
 0x96b   :  { %533 = vrot.lane.b32.xlu0 %v531_v47, %s1420_s8 }
 0x9dd   :  { %v534_v49 = vpop.permute.xlu0 %533 }
 0x9de   :  { %v536_v50 = vadd.f32 %v534_v49, %v526_v48 }
 0x9e0   :  { %1383 = vtanh.f32 %v536_v50 }
 0x9ed   :  { %v1384_v52 = vpop.eup %1383 }
 0x9ee   :  { %539 = vrot.lane.b32.xlu1 %v1384_v52, %s1419_s7 }
 0xa60   :  { %v540_v53 = vpop.permute.xlu1 %539 }
 0xa61   :  { %v542_v54 = vmul.f32 %v1382_v45, %v540_v53  ;;  %v1143_v45 = vld [vmem:[%s1692_s0 + $0x6] sm:$0x1] }
 0xa62   :  { %1314 = vmatmul.mubr.msk.bf16.vlgmr.msra.gmra.mxu1 %vm57_vm2, %v1143_v45 }
 0xa63   :  { %v543_v55 = vpack.c.bf16 %v542_v54, %v542_v54  ;;  %1326 = vmatpush3.bf16.msra.mxu1 %v1471_v2  ;;  %1329 = vmatprep.mubr.msk.bf16.mxu1 %vm1418_vm1, %v1417_v0 }
 0xa64   :  { %1327 = vmatprep.subr.bf16.mxu1 %v1417_v0 }
 0xa65   :  { %545 = vrot.lane.b32.xlu0 %v543_v55, %s1420_s8 }
 0xa67   :  { %1328 = vmatpush3.bf16.msra.mxu1 %v1488_v4 }
 0xad7   :  { %v546_v60 = vpop.permute.xlu0 %545 }
 0xad8   :  { %1274 = vmatmul.mubr.msk.bf16.vlgmr.msra.gmra.mxu0 %vm57_vm2, %v546_v60 }
 0xad9   :  { %1286 = vmatpush3.bf16.msra.mxu0 %v1462_v1  ;;  %1289 = vmatprep.mubr.msk.bf16.mxu0 %vm1418_vm1, %v1417_v0 }
 0xada   :  { %1287 = vmatprep.subr.bf16.mxu0 %v1417_v0 }
 0xadd   :  { %1288 = vmatpush3.bf16.msra.mxu0 %v1481_v3 }
 0xade   :  { %1301 = vmatprep.subr.bf16.mxu0 %v1417_v0 }
 0xb98   :  { %v584_v62 = vpop.f32.mrf.mxu0 }
 0xb99   :  { %v635_v63 = vadd.f32 %v630_v61, %v584_v62 }
 0xb9a   :  { %v1275_v5 = vpop.f32.mrf.mxu0 }
 0xb9b   :  { %1385 = vtanh.f32 %v635_v63  ;;  %v1137_v10 = vmul.f32 -1.442695, %v635_v63 }
 0xb9c   :  { %v587_v6 = vpop.f32.mrf.mxu0 }
 0xb9d   :  { %1387 = vpow2.f32 %v1137_v10 }
 0xb9e   :  { %v1276_v7 = vpop.f32.mrf.mxu0 }
 0xba8   :  { %v1386_v9 = vpop.eup %1385 }
 0xba9   :  { %645 = vrot.lane.b32.xlu1 %v1386_v9, %s1419_s7  ;;  %v1147_v9 = vld [vmem:[%s1692_s0 + $0x7] sm:$0x1] }
 0xbaa   :  { %v1388_v11 = vpop.eup %1387  ;;  %1330 = vmatmul.mubr.msk.bf16.vlgmr.msra.gmra.mxu1 %vm57_vm2, %v1147_v9 }
 0xbab   :  { %v639_v12 = vadd.f32 1.0, %v1388_v11 }
 0xbad   :  { %1389 = vrcp.f32 %v639_v12 }
 0xbba   :  { %v1390_v13 = vpop.eup %1389 }
 0xbbb   :  { %v643_v16 = vmul.f32 %v1390_v13, %v536_v50  ;;  %v863_v50 = vpop.f32.mrf.mxu1 }
 0xbbc   :  { %v864_v4 = vadd.f32 %v1515_v8, %v863_v50 }
 0xbbd   :  { %v1315_v51 = vpop.f32.mrf.mxu1 }
 0xbbf   :  { %v866_v52 = vpop.f32.mrf.mxu1 }
 0xbc1   :  { %v1316_v53 = vpop.f32.mrf.mxu1 }
 0xc1b   :  { %v646_v14 = vpop.permute.xlu1 %645 }
 0xc1c   :  { %v648_v15 = vmul.f32 %v1390_v13, %v646_v14 }
 0xc1e   :  { %650 = vrot.lane.b32.xlu0 %v648_v15, %s1420_s8 }
 0xc6a   :  { %v980_v14 = vpop.f32.mrf.mxu1 }
 0xc6b   :  { %v981_v19 = vadd.f32 %v1515_v8, %v980_v14 }
 0xc6c   :  { %v1331_v15 = vpop.f32.mrf.mxu1 }
 0xc90   :  { %v651_v17 = vpop.permute.xlu0 %650 }
 0xc91   :  { %v653_v18 = vadd.f32 %v651_v17, %v643_v16  ;;  %v983_v16 = vpop.f32.mrf.mxu1 }
 0xc93   :  { %1391 = vtanh.f32 %v653_v18  ;;  %v1332_v17 = vpop.f32.mrf.mxu1 }
 0xca0   :  { %v1392_v20 = vpop.eup %1391 }
 0xca1   :  { %656 = vrot.lane.b32.xlu1 %v1392_v20, %s1419_s7 }
 0xd13   :  { %v657_v21 = vpop.permute.xlu1 %656 }
 0xd14   :  { %v659_v22 = vmul.f32 %v1390_v13, %v657_v21 }
 0xd16   :  { %v660_v23 = vpack.c.bf16 %v659_v22, %v659_v22 }
 0xd18   :  { %662 = vrot.lane.b32.xlu0 %v660_v23, %s1420_s8 }
 0xd8a   :  { %v663_v28 = vpop.permute.xlu0 %662 }
 0xd8b   :  { %1290 = vmatmul.mubr.msk.bf16.vlgmr.msra.gmra.mxu0 %vm57_vm2, %v663_v28 }
 0xd8c   :  { %1302 = vmatpush3.bf16.msra.mxu0 %v1462_v1  ;;  %1305 = vmatprep.mubr.msk.bf16.mxu0 %vm1418_vm1, %v1417_v0 }
 0xd8d   :  { %1303 = vmatprep.subr.bf16.mxu0 %v1417_v0 }
 0xd90   :  { %1304 = vmatpush3.bf16.msra.mxu0 %v1481_v3 }
 0xd91   :  { %1317 = vmatprep.subr.bf16.mxu0 %v1417_v0 }
 0xe4b   :  { %v701_v30 = vpop.f32.mrf.mxu0 }
 0xe4c   :  { %v752_v31 = vadd.f32 %v747_v29, %v701_v30 }
 0xe4d   :  { %v1291_v32 = vpop.f32.mrf.mxu0 }
 0xe4e   :  { %1393 = vtanh.f32 %v752_v31  ;;  %v1141_v36 = vmul.f32 -1.442695, %v752_v31 }
 0xe4f   :  { %v704_v33 = vpop.f32.mrf.mxu0 }
 0xe50   :  { %1395 = vpow2.f32 %v1141_v36  ;;  %v1026_v36 = vld [vmem:[%s1694_s4 + $0x8] sm:$0xff] }
 0xe51   :  { %v1292_v34 = vpop.f32.mrf.mxu0 }
 0xe52   :  { %v1028_v34 = vld [vmem:[%s1694_s4 + $0x18] sm:$0xff] }
 0xe5b   :  { %v1394_v35 = vpop.eup %1393 }
 0xe5c   :  { %762 = vrot.lane.b32.xlu1 %v1394_v35, %s1419_s7  ;;  %v1027_v35 = vld [vmem:[%s1694_s4 + $0x10] sm:$0xff] }
 0xe5d   :  { %v1396_v37 = vpop.eup %1395 }
 0xe5e   :  { %v756_v38 = vadd.f32 1.0, %v1396_v37  ;;  %v1025_v37 = vld [vmem:[%s1694_s4] sm:$0xff] }
 0xe60   :  { %1397 = vrcp.f32 %v756_v38 }
 0xe6d   :  { %v1398_v39 = vpop.eup %1397 }
 0xe6e   :  { %v760_v42 = vmul.f32 %v1398_v39, %v653_v18 }
 0xece   :  { %v763_v40 = vpop.permute.xlu1 %762 }
 0xecf   :  { %v765_v41 = vmul.f32 %v1398_v39, %v763_v40 }
 0xed1   :  { %767 = vrot.lane.b32.xlu0 %v765_v41, %s1420_s8 }
 0xf43   :  { %v768_v43 = vpop.permute.xlu0 %767 }
 0xf44   :  { %v770_v44 = vadd.f32 %v768_v43, %v760_v42 }
 0xf46   :  { %1399 = vtanh.f32 %v770_v44 }
 0xf53   :  { %v1400_v46 = vpop.eup %1399 }
 0xf54   :  { %773 = vrot.lane.b32.xlu1 %v1400_v46, %s1419_s7 }
 0xfc6   :  { %v774_v47 = vpop.permute.xlu1 %773 }
 0xfc7   :  { %v776_v48 = vmul.f32 %v1398_v39, %v774_v47  ;;  %v11_v39 = vstv %s1695_s5 }
 0xfc8   :  { %12 = vst [vmem:[#allocation4] sm:$0x1] %v11_v39 }
 0xfc9   :  { %v777_v49 = vpack.c.bf16 %v776_v48, %v776_v48 }
 0xfcb   :  { %779 = vrot.lane.b32.xlu0 %v777_v49, %s1420_s8 }
0x103d   :  { %v780_v2 = vpop.permute.xlu0 %779 }
0x103e   :  { %1306 = vmatmul.mubr.msk.bf16.vlgmr.msra.gmra.mxu0 %vm57_vm2, %v780_v2 }
0x103f   :  { %1318 = vmatpush3.bf16.msra.mxu0 %v1462_v1  ;;  %1321 = vmatprep.mubr.msk.bf16.mxu0 %vm1418_vm1, %v1417_v0 }
0x1040   :  { %1319 = vmatprep.subr.bf16.mxu0 %v1417_v0 }
0x1043   :  { %1320 = vmatpush3.bf16.msra.mxu0 %v1481_v3 }
0x1044   :  { %1333 = vmatprep.subr.mxu0 %v1417_v0 }
0x10fe   :  { %v818_v54 = vpop.f32.mrf.mxu0 }
0x10ff   :  { %v869_v55 = vadd.f32 %v864_v4, %v818_v54 }
0x1100   :  { %v1307_v56 = vpop.f32.mrf.mxu0 }
0x1101   :  { %1401 = vtanh.f32 %v869_v55  ;;  %v1145_v1 = vmul.f32 -1.442695, %v869_v55 }
0x1102   :  { %v821_v57 = vpop.f32.mrf.mxu0 }
0x1103   :  { %1403 = vpow2.f32 %v1145_v1 }
0x1104   :  { %v1308_v58 = vpop.f32.mrf.mxu0 }
0x110e   :  { %v1402_v59 = vpop.eup %1401 }
0x110f   :  { %879 = vrot.lane.b32.xlu1 %v1402_v59, %s1419_s7 }
0x1110   :  { %v1404_v60 = vpop.eup %1403 }
0x1111   :  { %v873_v61 = vadd.f32 1.0, %v1404_v60 }
0x1113   :  { %1405 = vrcp.f32 %v873_v61 }
0x1120   :  { %v1406_v62 = vpop.eup %1405 }
0x1121   :  { %v877_v5 = vmul.f32 %v1406_v62, %v770_v44 }
0x1181   :  { %v880_v3 = vpop.permute.xlu1 %879 }
0x1182   :  { %v882_v63 = vmul.f32 %v1406_v62, %v880_v3 }
0x1184   :  { %884 = vrot.lane.b32.xlu0 %v882_v63, %s1420_s8 }
0x11f6   :  { %v885_v6 = vpop.permute.xlu0 %884 }
0x11f7   :  { %v887_v7 = vadd.f32 %v885_v6, %v877_v5 }
0x11f9   :  { %1407 = vtanh.f32 %v887_v7 }
0x1206   :  { %v1408_v10 = vpop.eup %1407 }
0x1207   :  { %890 = vrot.lane.b32.xlu1 %v1408_v10, %s1419_s7 }
0x1279   :  { %v891_v11 = vpop.permute.xlu1 %890 }
0x127a   :  { %v893_v12 = vmul.f32 %v1406_v62, %v891_v11 }
0x127c   :  { %v894_v13 = vpack.c.bf16 %v893_v12, %v893_v12 }
0x127e   :  { %896 = vrot.lane.b32.xlu0 %v894_v13, %s1420_s8 }
0x12f0   :  { %v897_v18 = vpop.permute.xlu0 %896 }
0x12f1   :  { %1322 = vmatmul.mubr.msk.bf16.vlgmr.msra.gmra.mxu0 %vm57_vm2, %v897_v18 }
0x12f2   :  { %1341 = vmatprep.mubr.msk.f32.mxu0 %vm1418_vm1, %v1417_v0  ;;  %1334 = vmatpush3.msra.mxu0 %v1028_v34 }
0x12f3   :  { %1335 = vmatprep.subr.mxu0 %v1417_v0 }
0x12f4   :  { %1336 = vmatpush3.msra.mxu0 %v1027_v35 }
0x12f5   :  { %1337 = vmatprep.subr.mxu0 %v1417_v0 }
0x12f6   :  { %1338 = vmatpush3.msra.mxu0 %v1026_v36 }
0x12f7   :  { %1339 = vmatprep.subr.mxu0 %v1417_v0  ;;  %v1150_v0 = vld [vmem:[#allocation4] ss:$0 sm:$0xff] }
0x12f8   :  { %1340 = vmatpush3.msra.mxu0 %v1025_v37 }
0x13b1   :  { %v935_v20 = vpop.f32.mrf.mxu0 }
0x13b2   :  { %v986_v21 = vadd.f32 %v981_v19, %v935_v20 }
0x13b3   :  { %v1323_v22 = vpop.f32.mrf.mxu0 }
0x13b4   :  { %1409 = vtanh.f32 %v986_v21  ;;  %v1149_v26 = vmul.f32 -1.442695, %v986_v21 }
0x13b5   :  { %v938_v23 = vpop.f32.mrf.mxu0 }
0x13b6   :  { %1411 = vpow2.f32 %v1149_v26 }
0x13b7   :  { %v1324_v24 = vpop.f32.mrf.mxu0 }
0x13c1   :  { %v1410_v25 = vpop.eup %1409 }
0x13c2   :  { %996 = vrot.lane.b32.xlu1 %v1410_v25, %s1419_s7 }
0x13c3   :  { %v1412_v27 = vpop.eup %1411 }
0x13c4   :  { %v990_v28 = vadd.f32 1.0, %v1412_v27 }
0x13c6   :  { %1413 = vrcp.f32 %v990_v28 }
0x13d3   :  { %v1414_v29 = vpop.eup %1413 }
0x13d4   :  { %v994_v8 = vmul.f32 %v1414_v29, %v887_v7 }
0x1434   :  { %v997_v30 = vpop.permute.xlu1 %996 }
0x1435   :  { %v999_v31 = vmul.f32 %v1414_v29, %v997_v30 }
0x1437   :  { %1001 = vrot.lane.b32.xlu0 %v999_v31, %s1420_s8 }
0x14a9   :  { %v1002_v32 = vpop.permute.xlu0 %1001 }
0x14aa   :  { %v1004_v33 = vadd.f32 %v1002_v32, %v994_v8 }
0x14ac   :  { %1415 = vtanh.f32 %v1004_v33 }
0x14b9   :  { %v1416_v38 = vpop.eup %1415 }
0x14ba   :  { %1007 = vrot.lane.b32.xlu1 %v1416_v38, %s1419_s7 }
0x14be   :  { %1018 = vrot.lane.b32.xlu1 %v1004_v33, %s1421_s29 }
0x152c   :  { %v1008_v40 = vpop.permute.xlu1 %1007 }
0x152d   :  { %v1010_v41 = vmul.f32 %v1414_v29, %v1008_v40 }
0x152f   :  { %1012 = vrot.lane.b32.xlu0 %v1010_v41, %s1420_s8 }
0x1530   :  { %v1019_v42 = vpop.permute.xlu1 %1018 }
0x1531   :  { %1021 = vst.msk [vmem:[#allocation3] sm:$0x3] %vm30_vm0, %v1019_v42 }
0x15a1   :  { %v1013_v43 = vpop.permute.xlu0 %1012 }
0x15a2   :  { %1016 = vst.msk [vmem:[#allocation2] sm:$0x3] %vm30_vm0, %v1013_v43  ;;  %1342 = vmatmul.mubr.msk.f32.vlgmr.msra.gmra.mxu0 %vm57_vm2, %v1013_v43 }
0x1662   :  { %v1104_v44 = vpop.f32.mrf.mxu0 }
0x1663   :  { %v1105_v45 = vadd.f32 %v1150_v0, %v1104_v44 }
0x1664   :  { %v1343_v46 = vpop.f32.mrf.mxu0 }
0x1665   :  { %1109 = vst.msk [vmem:[%s1696_s6] sm:$0x3] %vm1108_vm3, %v1105_v45 }

// kernel: lstm_forward.2
= control target key start
LH: loop header
LB: loop body
LE: loop exit
PB: predicated region body
PF: predicated region fallthrough
CT: control target
= control target key end

     0   :  { %vm101_vm0 = vcmask 1041408   ;;  %v1427_v0 = vmov 0.0   ;;  %vm1428_vm1 = vmmov 0   ;;  %vm97_vm2 = vcmask 31744   ;;  %s1429_s23 = smov 64   ;;  %s1430_s24 = smov 32   ;;  %s1709_s1 = inlined_call_operand.vmem [shape: bf16[4,128], index: 1, kind: input, shape index: {}]   ;;  %s1710_s2 = inlined_call_operand.vmem [shape: bf16[32,128], index: 2, kind: input, shape index: {}]   ;;  %s1711_s0 = inlined_call_operand.vmem [shape: bf16[8,2,4], index: 0, kind: input, shape index: {}]   ;;  %s1712_s3 = inlined_call_operand.vmem [shape: f32[1,128], index: 3, kind: input, shape index: {}]   ;;  %s1713_s4 = inlined_call_operand.vmem [shape: bf16[8,2,32], index: 4, kind: output, shape index: {}]  }
   0x1   :  { %1251 = vmatprep.subr.bf16.mxu1 %v1427_v0  ;;  %1243 = vmatprep.subr.bf16.mxu0 %v1427_v0  ;;  %v25_v1 = vld [vmem:[%s1709_s1] sm:$0x3]  ;;  %v1468_v3 = vld [vmem:[%s1710_s2 + $0x8] sm:$0xff]   ;;  %vm22_vm3 = vcmask 254976   ;;  %vm46_vm4 = vcmask 261120   ;;  %vm193_vm5 = vcmask 253952  }
   0x2   :  { %v1463_v2 = vsel %vm101_vm0, %v25_v1, 0  ;;  %1253 = vmatprep.mubr.msk.bf16.mxu1 %vm1428_vm1, %v1427_v0  ;;  %1247 = vmatprep.mubr.msk.bf16.mxu0 %vm1428_vm1, %v1427_v0  ;;  %v90_v4 = vld [vmem:[%s1711_s0] sm:$0x1]  ;;  %23 = vst.msk [vmem:[#allocation2] sm:$0x3] %vm22_vm3, %v1427_v0 }
   0x3   :  { %1252 = vmatpush3.bf16.msra.mxu1 %v1463_v2  ;;  %1244 = vmatpush3.bf16.msra.mxu0 %v1468_v3  ;;  %v1482_v5 = vld [vmem:[%s1710_s2] sm:$0xff]   ;;  %24 = vst.msk [vmem:[#allocation3] sm:$0x3] %vm22_vm3, %v1427_v0 }
   0x4   :  { %1257 = vmatprep.subr.bf16.mxu1 %v1427_v0  ;;  %1245 = vmatprep.subr.bf16.mxu0 %v1427_v0  ;;  %v1507_v9 = vld [vmem:[%s1712_s3] ss:$0 sm:$0xff]  ;;  %v1169_v31 = vld [vmem:[%s1711_s0 + $0x1] sm:$0x1]  ;;  %v1174_v57 = vld [vmem:[%s1711_s0 + $0x2] sm:$0x1] }
   0x6   :  { %1254 = vmatmul.mubr.msk.bf16.vlgmr.msra.gmra.mxu1 %vm97_vm2, %v90_v4 }
   0x7   :  { %1258 = vmatpush3.bf16.msra.mxu1 %v1468_v3  ;;  %1261 = vmatprep.mubr.msk.bf16.mxu1 %vm1428_vm1, %v1427_v0 }
   0x8   :  { %1246 = vmatpush3.bf16.msra.mxu0 %v1482_v5  ;;  %1259 = vmatprep.subr.bf16.mxu1 %v1427_v0 }
   0x9   :  { %1265 = vmatprep.subr.bf16.mxu0 %v1427_v0  ;;  %v31_v6 = vld [vmem:[#allocation2] sm:$0x3] }
   0xa   :  { %v33_v7 = vpack.c.bf16 %v31_v6, %v31_v6  ;;  %v32_v20 = vld [vmem:[#allocation3] sm:$0x3] }
   0xb   :  { %1260 = vmatpush3.bf16.msra.mxu1 %v1482_v5 }
   0xc   :  { %1271 = vmatprep.subr.bf16.mxu1 %v1427_v0  ;;  %1248 = vmatmul.mubr.msk.bf16.vlgmr.msra.gmra.mxu0 %vm46_vm4, %v33_v7 }
   0xd   :  { %1266 = vmatpush3.bf16.msra.mxu0 %v1463_v2  ;;  %1267 = vmatprep.mubr.msk.bf16.mxu0 %vm1428_vm1, %v1427_v0 }
   0xe   :  { %1279 = vmatprep.subr.bf16.mxu0 %v1427_v0 }
  0x14   :  { %1268 = vmatmul.mubr.msk.bf16.vlgmr.msra.gmra.mxu0 %vm97_vm2, %v1169_v31 }
  0x15   :  { %1280 = vmatpush3.bf16.msra.mxu0 %v1463_v2  ;;  %1281 = vmatprep.mubr.msk.bf16.mxu0 %vm1428_vm1, %v1427_v0 }
  0x16   :  { %1293 = vmatprep.subr.bf16.mxu0 %v1427_v0 }
  0x1c   :  { %1282 = vmatmul.mubr.msk.bf16.vlgmr.msra.gmra.mxu0 %vm97_vm2, %v1174_v57 }
  0x1d   :  { %1294 = vmatpush3.bf16.msra.mxu0 %v1463_v2  ;;  %1295 = vmatprep.mubr.msk.bf16.mxu0 %vm1428_vm1, %v1427_v0 }
  0x1e   :  { %1307 = vmatprep.subr.bf16.mxu0 %v1427_v0 }
  0xc6   :  { %v139_v8 = vpop.f32.mrf.mxu1 }
  0xc7   :  { %v140_v12 = vadd.f32 %v1507_v9, %v139_v8 }
  0xc8   :  { %v1255_v10 = vpop.f32.mrf.mxu1 }
  0xca   :  { %v142_v11 = vpop.f32.mrf.mxu1 }
  0xcc   :  { %v1256_v13 = vpop.f32.mrf.mxu1  ;;  %v84_v14 = vpop.f32.mrf.mxu0 }
  0xcd   :  { %v145_v15 = vadd.f32 %v140_v12, %v84_v14 }
  0xce   :  { %v1249_v16 = vpop.f32.mrf.mxu0 }
  0xcf   :  { %1363 = vtanh.f32 %v145_v15  ;;  %v1167_v21 = vmul.f32 -1.442695, %v145_v15 }
  0xd0   :  { %v87_v17 = vpop.f32.mrf.mxu0 }
  0xd1   :  { %1365 = vpow2.f32 %v1167_v21 }
  0xd2   :  { %v1250_v18 = vpop.f32.mrf.mxu0 }
  0xd4   :  { %v279_v36 = vpop.f32.mrf.mxu0 }
  0xd5   :  { %v280_v41 = vadd.f32 %v1507_v9, %v279_v36 }
  0xd6   :  { %v1269_v37 = vpop.f32.mrf.mxu0 }
  0xd8   :  { %v282_v38 = vpop.f32.mrf.mxu0 }
  0xda   :  { %v1270_v39 = vpop.f32.mrf.mxu0 }
  0xdc   :  { %v1364_v19 = vpop.eup %1363  ;;  %v415_v62 = vpop.f32.mrf.mxu0 }
  0xdd   :  { %159 = vrot.lane.b32.xlu0 %v1364_v19, %s1429_s23  ;;  %v416_v7 = vadd.f32 %v1507_v9, %v415_v62 }
  0xde   :  { %v1366_v22 = vpop.eup %1365  ;;  %v1283_v63 = vpop.f32.mrf.mxu0 }
  0xdf   :  { %v149_v23 = vadd.f32 1.0, %v1366_v22 }
  0xe0   :  { %v418_v1 = vpop.f32.mrf.mxu0 }
  0xe1   :  { %154 = vrot.lane.b32.xlu0 %v32_v20, %s1430_s24  ;;  %1367 = vrcp.f32 %v149_v23 }
  0xe2   :  { %v1284_v4 = vpop.f32.mrf.mxu0 }
  0xee   :  { %v1368_v24 = vpop.eup %1367 }
 0x14f   :  { %v160_v25 = vpop.permute.xlu0 %159 }
 0x150   :  { %v162_v26 = vmul.f32 %v1368_v24, %v160_v25 }
 0x152   :  { %164 = vrot.lane.b32.xlu1 %v162_v26, %s1430_s24 }
 0x153   :  { %v155_v27 = vpop.permute.xlu0 %154 }
 0x154   :  { %v157_v28 = vmul.f32 %v1368_v24, %v155_v27 }
 0x1c4   :  { %v165_v29 = vpop.permute.xlu1 %164 }
 0x1c5   :  { %v167_v30 = vadd.f32 %v165_v29, %v157_v28 }
 0x1c7   :  { %1369 = vtanh.f32 %v167_v30 }
 0x1d4   :  { %v1370_v32 = vpop.eup %1369 }
 0x1d5   :  { %170 = vrot.lane.b32.xlu1 %v1370_v32, %s1429_s23 }
 0x247   :  { %v171_v33 = vpop.permute.xlu1 %170 }
 0x248   :  { %v173_v34 = vmul.f32 %v1368_v24, %v171_v33  ;;  %v1179_v24 = vld [vmem:[%s1711_s0 + $0x3] sm:$0x1] }
 0x249   :  { %1296 = vmatmul.mubr.msk.bf16.vlgmr.msra.gmra.mxu0 %vm97_vm2, %v1179_v24 }
 0x24a   :  { %v1522_v35 = vpack.c.bf16 %v173_v34, %v173_v34  ;;  %1308 = vmatpush3.bf16.msra.mxu0 %v1463_v2  ;;  %1309 = vmatprep.mubr.msk.bf16.mxu0 %vm1428_vm1, %v1427_v0 }
 0x24b   :  { %1321 = vmatprep.subr.bf16.mxu0 %v1427_v0 }
 0x24c   :  { %195 = vrot.lane.b32.xlu0 %v1522_v35, %s1430_s24 }
 0x2be   :  { %v196_v40 = vpop.permute.xlu0 %195 }
 0x2bf   :  { %1262 = vmatmul.mubr.msk.bf16.vlgmr.msra.gmra.mxu1 %vm46_vm4, %v196_v40 }
 0x2c0   :  { %1272 = vmatpush3.bf16.msra.mxu1 %v1468_v3  ;;  %1275 = vmatprep.mubr.msk.bf16.mxu1 %vm1428_vm1, %v1427_v0 }
 0x2c1   :  { %1273 = vmatprep.subr.bf16.mxu1 %v1427_v0 }
 0x2c4   :  { %1274 = vmatpush3.bf16.msra.mxu1 %v1482_v5 }
 0x2c5   :  { %1285 = vmatprep.subr.bf16.mxu1 %v1427_v0 }
 0x309   :  { %v551_v29 = vpop.f32.mrf.mxu0 }
 0x30a   :  { %v552_v34 = vadd.f32 %v1507_v9, %v551_v29 }
 0x37f   :  { %v234_v42 = vpop.f32.mrf.mxu1 }
 0x380   :  { %v285_v43 = vadd.f32 %v280_v41, %v234_v42 }
 0x381   :  { %v1263_v44 = vpop.f32.mrf.mxu1 }
 0x382   :  { %1371 = vtanh.f32 %v285_v43  ;;  %v1171_v48 = vmul.f32 -1.442695, %v285_v43 }
 0x383   :  { %v237_v45 = vpop.f32.mrf.mxu1 }
 0x384   :  { %1373 = vpow2.f32 %v1171_v48 }
 0x385   :  { %v1264_v46 = vpop.f32.mrf.mxu1 }
 0x38f   :  { %v1372_v47 = vpop.eup %1371 }
 0x390   :  { %295 = vrot.lane.b32.xlu1 %v1372_v47, %s1429_s23 }
 0x391   :  { %v1374_v49 = vpop.eup %1373 }
 0x392   :  { %v289_v50 = vadd.f32 1.0, %v1374_v49 }
 0x394   :  { %1375 = vrcp.f32 %v289_v50 }
 0x3a1   :  { %v1376_v51 = vpop.eup %1375 }
 0x3a2   :  { %v293_v54 = vmul.f32 %v1376_v51, %v167_v30  ;;  %v1297_v30 = vpop.f32.mrf.mxu0 }
 0x3a4   :  { %v554_v31 = vpop.f32.mrf.mxu0 }
 0x3a6   :  { %v1298_v32 = vpop.f32.mrf.mxu0 }
 0x402   :  { %v296_v52 = vpop.permute.xlu1 %295 }
 0x403   :  { %v298_v53 = vmul.f32 %v1376_v51, %v296_v52 }
 0x405   :  { %300 = vrot.lane.b32.xlu0 %v298_v53, %s1430_s24 }
 0x477   :  { %v301_v55 = vpop.permute.xlu0 %300 }
 0x478   :  { %v303_v56 = vadd.f32 %v301_v55, %v293_v54 }
 0x47a   :  { %1377 = vtanh.f32 %v303_v56 }
 0x487   :  { %v1378_v58 = vpop.eup %1377 }
 0x488   :  { %306 = vrot.lane.b32.xlu1 %v1378_v58, %s1429_s23 }
 0x4fa   :  { %v307_v59 = vpop.permute.xlu1 %306 }
 0x4fb   :  { %v309_v60 = vmul.f32 %v1376_v51, %v307_v59  ;;  %v1184_v51 = vld [vmem:[%s1711_s0 + $0x4] sm:$0x1] }
 0x4fc   :  { %1310 = vmatmul.mubr.msk.bf16.vlgmr.msra.gmra.mxu0 %vm97_vm2, %v1184_v51 }
 0x4fd   :  { %v1545_v61 = vpack.c.bf16 %v309_v60, %v309_v60  ;;  %1322 = vmatpush3.bf16.msra.mxu0 %v1463_v2  ;;  %1323 = vmatprep.mubr.msk.bf16.mxu0 %vm1428_vm1, %v1427_v0 }
 0x4fe   :  { %1335 = vmatprep.subr.bf16.mxu0 %v1427_v0 }
 0x4ff   :  { %331 = vrot.lane.b32.xlu0 %v1545_v61, %s1430_s24 }
 0x571   :  { %v332_v6 = vpop.permute.xlu0 %331 }
 0x572   :  { %1276 = vmatmul.mubr.msk.bf16.vlgmr.msra.gmra.mxu1 %vm46_vm4, %v332_v6 }
 0x573   :  { %1286 = vmatpush3.bf16.msra.mxu1 %v1468_v3  ;;  %1289 = vmatprep.mubr.msk.bf16.mxu1 %vm1428_vm1, %v1427_v0 }
 0x574   :  { %1287 = vmatprep.subr.bf16.mxu1 %v1427_v0 }
 0x577   :  { %1288 = vmatpush3.bf16.msra.mxu1 %v1482_v5 }
 0x578   :  { %1299 = vmatprep.subr.bf16.mxu1 %v1427_v0 }
 0x632   :  { %v370_v8 = vpop.f32.mrf.mxu1 }
 0x633   :  { %v421_v10 = vadd.f32 %v416_v7, %v370_v8 }
 0x634   :  { %v1277_v11 = vpop.f32.mrf.mxu1 }
 0x635   :  { %1379 = vtanh.f32 %v421_v10  ;;  %v1176_v15 = vmul.f32 -1.442695, %v421_v10 }
 0x636   :  { %v373_v12 = vpop.f32.mrf.mxu1 }
 0x637   :  { %1381 = vpow2.f32 %v1176_v15 }
 0x638   :  { %v1278_v13 = vpop.f32.mrf.mxu1 }
 0x642   :  { %v1380_v14 = vpop.eup %1379 }
 0x643   :  { %431 = vrot.lane.b32.xlu1 %v1380_v14, %s1429_s23 }
 0x644   :  { %v1382_v16 = vpop.eup %1381 }
 0x645   :  { %v425_v17 = vadd.f32 1.0, %v1382_v16 }
 0x647   :  { %1383 = vrcp.f32 %v425_v17 }
 0x654   :  { %v1384_v18 = vpop.eup %1383 }
 0x655   :  { %v429_v21 = vmul.f32 %v1384_v18, %v303_v56  ;;  %v687_v56 = vpop.f32.mrf.mxu0 }
 0x656   :  { %v688_v62 = vadd.f32 %v1507_v9, %v687_v56 }
 0x657   :  { %v1311_v57 = vpop.f32.mrf.mxu0 }
 0x659   :  { %v690_v58 = vpop.f32.mrf.mxu0 }
 0x65b   :  { %v1312_v59 = vpop.f32.mrf.mxu0 }
 0x6b5   :  { %v432_v19 = vpop.permute.xlu1 %431 }
 0x6b6   :  { %v434_v20 = vmul.f32 %v1384_v18, %v432_v19  ;;  %v1189_v19 = vld [vmem:[%s1711_s0 + $0x5] sm:$0x1] }
 0x6b7   :  { %1324 = vmatmul.mubr.msk.bf16.vlgmr.msra.gmra.mxu0 %vm97_vm2, %v1189_v19 }
 0x6b8   :  { %436 = vrot.lane.b32.xlu0 %v434_v20, %s1430_s24  ;;  %1336 = vmatpush3.bf16.msra.mxu0 %v1463_v2 }
 0x6b9   :  { %1337 = vmatprep.mubr.msk.bf16.mxu0 %vm1428_vm1, %v1427_v0  ;;  %1349 = vmatprep.subr.bf16.mxu0 %v1427_v0 }
 0x72a   :  { %v437_v22 = vpop.permute.xlu0 %436 }
 0x72b   :  { %v439_v23 = vadd.f32 %v437_v22, %v429_v21 }
 0x72d   :  { %1385 = vtanh.f32 %v439_v23 }
 0x73a   :  { %v1386_v25 = vpop.eup %1385 }
 0x73b   :  { %442 = vrot.lane.b32.xlu1 %v1386_v25, %s1429_s23 }
 0x777   :  { %v823_v24 = vpop.f32.mrf.mxu0 }
 0x778   :  { %v824_v30 = vadd.f32 %v1507_v9, %v823_v24 }
 0x779   :  { %v1325_v25 = vpop.f32.mrf.mxu0 }
 0x7ad   :  { %v443_v26 = vpop.permute.xlu1 %442 }
 0x7ae   :  { %v445_v27 = vmul.f32 %v1384_v18, %v443_v26  ;;  %v826_v26 = vpop.f32.mrf.mxu0 }
 0x7b0   :  { %v1568_v28 = vpack.c.bf16 %v445_v27, %v445_v27  ;;  %v1326_v27 = vpop.f32.mrf.mxu0 }
 0x7b2   :  { %467 = vrot.lane.b32.xlu0 %v1568_v28, %s1430_s24 }
 0x824   :  { %v468_v33 = vpop.permute.xlu0 %467 }
 0x825   :  { %1290 = vmatmul.mubr.msk.bf16.vlgmr.msra.gmra.mxu1 %vm46_vm4, %v468_v33 }
 0x826   :  { %1300 = vmatpush3.bf16.msra.mxu1 %v1468_v3  ;;  %1303 = vmatprep.mubr.msk.bf16.mxu1 %vm1428_vm1, %v1427_v0 }
 0x827   :  { %1301 = vmatprep.subr.bf16.mxu1 %v1427_v0 }
 0x82a   :  { %1302 = vmatpush3.bf16.msra.mxu1 %v1482_v5 }
 0x82b   :  { %1313 = vmatprep.subr.bf16.mxu1 %v1427_v0 }
 0x8e5   :  { %v506_v36 = vpop.f32.mrf.mxu1 }
 0x8e6   :  { %v557_v37 = vadd.f32 %v552_v34, %v506_v36 }
 0x8e7   :  { %v1291_v38 = vpop.f32.mrf.mxu1 }
 0x8e8   :  { %1387 = vtanh.f32 %v557_v37  ;;  %v1181_v42 = vmul.f32 -1.442695, %v557_v37 }
 0x8e9   :  { %v509_v39 = vpop.f32.mrf.mxu1 }
 0x8ea   :  { %1389 = vpow2.f32 %v1181_v42 }
 0x8eb   :  { %v1292_v40 = vpop.f32.mrf.mxu1 }
 0x8f5   :  { %v1388_v41 = vpop.eup %1387 }
 0x8f6   :  { %567 = vrot.lane.b32.xlu1 %v1388_v41, %s1429_s23 }
 0x8f7   :  { %v1390_v43 = vpop.eup %1389 }
 0x8f8   :  { %v561_v44 = vadd.f32 1.0, %v1390_v43 }
 0x8fa   :  { %1391 = vrcp.f32 %v561_v44 }
 0x907   :  { %v1392_v45 = vpop.eup %1391 }
 0x908   :  { %v565_v48 = vmul.f32 %v1392_v45, %v439_v23 }
 0x968   :  { %v568_v46 = vpop.permute.xlu1 %567 }
 0x969   :  { %v570_v47 = vmul.f32 %v1392_v45, %v568_v46 }
 0x96b   :  { %572 = vrot.lane.b32.xlu0 %v570_v47, %s1430_s24  ;;  %v1194_v47 = vld [vmem:[%s1711_s0 + $0x6] sm:$0x1] }
 0x96c   :  { %1338 = vmatmul.mubr.msk.bf16.vlgmr.msra.gmra.mxu0 %vm97_vm2, %v1194_v47 }
 0x96d   :  { %1350 = vmatpush3.bf16.msra.mxu0 %v1463_v2  ;;  %1351 = vmatprep.mubr.msk.bf16.mxu0 %vm1428_vm1, %v1427_v0 }
 0x9dd   :  { %v573_v49 = vpop.permute.xlu0 %572 }
 0x9de   :  { %v575_v50 = vadd.f32 %v573_v49, %v565_v48 }
 0x9e0   :  { %1393 = vtanh.f32 %v575_v50 }
 0x9ed   :  { %v1394_v52 = vpop.eup %1393 }
 0x9ee   :  { %578 = vrot.lane.b32.xlu1 %v1394_v52, %s1429_s23 }
 0xa2c   :  { %v959_v52 = vpop.f32.mrf.mxu0 }
 0xa2d   :  { %v960_v2 = vadd.f32 %v1507_v9, %v959_v52 }
 0xa60   :  { %v579_v53 = vpop.permute.xlu1 %578 }
 0xa61   :  { %v581_v54 = vmul.f32 %v1392_v45, %v579_v53  ;;  %v1339_v53 = vpop.f32.mrf.mxu0 }
 0xa63   :  { %v1591_v55 = vpack.c.bf16 %v581_v54, %v581_v54  ;;  %v962_v54 = vpop.f32.mrf.mxu0 }
 0xa65   :  { %603 = vrot.lane.b32.xlu0 %v1591_v55, %s1430_s24  ;;  %v1340_v56 = vpop.f32.mrf.mxu0 }
 0xad7   :  { %v604_v60 = vpop.permute.xlu0 %603 }
 0xad8   :  { %1304 = vmatmul.mubr.msk.bf16.vlgmr.msra.gmra.mxu1 %vm46_vm4, %v604_v60 }
 0xad9   :  { %1314 = vmatpush3.bf16.msra.mxu1 %v1468_v3  ;;  %1317 = vmatprep.mubr.msk.bf16.mxu1 %vm1428_vm1, %v1427_v0 }
 0xada   :  { %1315 = vmatprep.subr.bf16.mxu1 %v1427_v0 }
 0xadd   :  { %1316 = vmatpush3.bf16.msra.mxu1 %v1482_v5 }
 0xade   :  { %1327 = vmatprep.subr.bf16.mxu1 %v1427_v0 }
 0xb98   :  { %v642_v63 = vpop.f32.mrf.mxu1 }
 0xb99   :  { %v693_v1 = vadd.f32 %v688_v62, %v642_v63 }
 0xb9a   :  { %v1305_v4 = vpop.f32.mrf.mxu1 }
 0xb9b   :  { %1395 = vtanh.f32 %v693_v1  ;;  %v1186_v10 = vmul.f32 -1.442695, %v693_v1 }
 0xb9c   :  { %v645_v6 = vpop.f32.mrf.mxu1 }
 0xb9d   :  { %1397 = vpow2.f32 %v1186_v10 }
 0xb9e   :  { %v1306_v7 = vpop.f32.mrf.mxu1 }
 0xba8   :  { %v1396_v8 = vpop.eup %1395 }
 0xba9   :  { %703 = vrot.lane.b32.xlu1 %v1396_v8, %s1429_s23 }
 0xbaa   :  { %v1398_v11 = vpop.eup %1397 }
 0xbab   :  { %v697_v12 = vadd.f32 1.0, %v1398_v11 }
 0xbad   :  { %1399 = vrcp.f32 %v697_v12  ;;  %v1199_v12 = vld [vmem:[%s1711_s0 + $0x7] sm:$0x1] }
 0xbae   :  { %1352 = vmatmul.mubr.msk.bf16.vlgmr.msra.gmra.mxu0 %vm97_vm2, %v1199_v12 }
 0xbba   :  { %v1400_v13 = vpop.eup %1399 }
 0xbbb   :  { %v701_v16 = vmul.f32 %v1400_v13, %v575_v50 }
 0xc1b   :  { %v704_v14 = vpop.permute.xlu1 %703 }
 0xc1c   :  { %v706_v15 = vmul.f32 %v1400_v13, %v704_v14 }
 0xc1e   :  { %708 = vrot.lane.b32.xlu0 %v706_v15, %s1430_s24 }
 0xc90   :  { %v709_v17 = vpop.permute.xlu0 %708 }
 0xc91   :  { %v711_v18 = vadd.f32 %v709_v17, %v701_v16  ;;  %v1095_v17 = vpop.f32.mrf.mxu0 }
 0xc93   :  { %1401 = vtanh.f32 %v711_v18 }
 0xca0   :  { %v1402_v20 = vpop.eup %1401 }
 0xca1   :  { %714 = vrot.lane.b32.xlu1 %v1402_v20, %s1429_s23 }
 0xd13   :  { %v715_v21 = vpop.permute.xlu1 %714 }
 0xd14   :  { %v717_v22 = vmul.f32 %v1400_v13, %v715_v21 }
 0xd16   :  { %v1614_v23 = vpack.c.bf16 %v717_v22, %v717_v22  ;;  %v1096_v22 = vadd.f32 %v1507_v9, %v1095_v17 }
 0xd18   :  { %739 = vrot.lane.b32.xlu0 %v1614_v23, %s1430_s24 }
 0xd8a   :  { %v740_v29 = vpop.permute.xlu0 %739 }
 0xd8b   :  { %1318 = vmatmul.mubr.msk.bf16.vlgmr.msra.gmra.mxu1 %vm46_vm4, %v740_v29 }
 0xd8c   :  { %1328 = vmatpush3.bf16.msra.mxu1 %v1468_v3  ;;  %1331 = vmatprep.mubr.msk.bf16.mxu1 %vm1428_vm1, %v1427_v0 }
 0xd8d   :  { %1329 = vmatprep.subr.bf16.mxu1 %v1427_v0 }
 0xd90   :  { %1330 = vmatpush3.bf16.msra.mxu1 %v1482_v5 }
 0xd91   :  { %1341 = vmatprep.subr.bf16.mxu1 %v1427_v0 }
 0xe4b   :  { %v778_v31 = vpop.f32.mrf.mxu1 }
 0xe4c   :  { %v829_v32 = vadd.f32 %v824_v30, %v778_v31 }
 0xe4d   :  { %v1319_v33 = vpop.f32.mrf.mxu1 }
 0xe4e   :  { %1403 = vtanh.f32 %v829_v32  ;;  %v1191_v38 = vmul.f32 -1.442695, %v829_v32 }
 0xe4f   :  { %v781_v34 = vpop.f32.mrf.mxu1 }
 0xe50   :  { %1405 = vpow2.f32 %v1191_v38  ;;  %v1431_v34 = vmov 1966171168  }
 0xe51   :  { %v1320_v36 = vpop.f32.mrf.mxu1 }
 0xe52   :  { %v177_v36 = vunpack.c.l.s4 %v1431_v34 }
 0xe54   :  { %v178_v38 = vunpack.c.0.s8 %v177_v36 }
 0xe5b   :  { %v1404_v37 = vpop.eup %1403 }
 0xe5c   :  { %839 = vrot.lane.b32.xlu1 %v1404_v37, %s1429_s23  ;;  %v179_v37 = vlaneseq }
 0xe5d   :  { %v1406_v39 = vpop.eup %1405 }
 0xe5e   :  { %v833_v40 = vadd.f32 1.0, %v1406_v39  ;;  %v180_v39 = vshrl.u32 %v179_v37, 7 }
 0xe60   :  { %1407 = vrcp.f32 %v833_v40  ;;  %v181_v9 = vsub.s32 %v178_v38, %v180_v39 }
 0xe62   :  { %v318_v56 = vrot.slane %v1545_v61, %v181_v9 }
 0xe6d   :  { %v1408_v41 = vpop.eup %1407 }
 0xe6e   :  { %v837_v44 = vmul.f32 %v1408_v41, %v711_v18  ;;  %v1353_v18 = vpop.f32.mrf.mxu0 }
 0xe70   :  { %v1098_v19 = vpop.f32.mrf.mxu0 }
 0xe72   :  { %v1354_v20 = vpop.f32.mrf.mxu0 }
 0xece   :  { %v840_v42 = vpop.permute.xlu1 %839 }
 0xecf   :  { %v842_v43 = vmul.f32 %v1408_v41, %v840_v42  ;;  %v182_v42 = vrot.slane %v1522_v35, %v181_v9 }
 0xed1   :  { %844 = vrot.lane.b32.xlu0 %v842_v43, %s1430_s24 }
 0xf43   :  { %v845_v45 = vpop.permute.xlu0 %844 }
 0xf44   :  { %v847_v46 = vadd.f32 %v845_v45, %v837_v44  ;;  %v454_v44 = vrot.slane %v1568_v28, %v181_v9  ;;  %v189_v45 = vrot.slane %v182_v42, %v181_v9 }
 0xf46   :  { %1409 = vtanh.f32 %v847_v46  ;;  %v461_v47 = vrot.slane %v454_v44, %v181_v9 }
 0xf53   :  { %v1410_v48 = vpop.eup %1409 }
 0xf54   :  { %850 = vrot.lane.b32.xlu1 %v1410_v48, %s1429_s23 }
 0xfc6   :  { %v851_v49 = vpop.permute.xlu1 %850 }
 0xfc7   :  { %v853_v50 = vmul.f32 %v1408_v41, %v851_v49 }
 0xfc9   :  { %v1636_v51 = vpack.c.bf16 %v853_v50, %v853_v50 }
 0xfcb   :  { %875 = vrot.lane.b32.xlu0 %v1636_v51, %s1430_s24 }
0x103d   :  { %v876_v57 = vpop.permute.xlu0 %875 }
0x103e   :  { %1332 = vmatmul.mubr.msk.bf16.vlgmr.msra.gmra.mxu1 %vm46_vm4, %v876_v57 }
0x103f   :  { %1342 = vmatpush3.bf16.msra.mxu1 %v1468_v3  ;;  %1345 = vmatprep.mubr.msk.bf16.mxu1 %vm1428_vm1, %v1427_v0 }
0x1040   :  { %1343 = vmatprep.subr.bf16.mxu1 %v1427_v0 }
0x1043   :  { %1344 = vmatpush3.bf16.msra.mxu1 %v1482_v5 }
0x10fe   :  { %v914_v58 = vpop.f32.mrf.mxu1 }
0x10ff   :  { %v965_v59 = vadd.f32 %v960_v2, %v914_v58  ;;  %v590_v58 = vrot.slane %v1591_v55, %v181_v9 }
0x1100   :  { %v1333_v60 = vpop.f32.mrf.mxu1 }
0x1101   :  { %1411 = vtanh.f32 %v965_v59  ;;  %v1196_v4 = vmul.f32 -1.442695, %v965_v59  ;;  %v325_v59 = vrot.slane %v318_v56, %v181_v9  ;;  %v862_v60 = vrot.slane %v1636_v51, %v181_v9 }
0x1102   :  { %v917_v62 = vpop.f32.mrf.mxu1 }
0x1103   :  { %1413 = vpow2.f32 %v1196_v4  ;;  %v597_v62 = vrot.slane %v590_v58, %v181_v9  ;;  %v869_v61 = vrot.slane %v862_v60, %v181_v9 }
0x1104   :  { %v1334_v63 = vpop.f32.mrf.mxu1 }
0x110e   :  { %v1412_v1 = vpop.eup %1411 }
0x110f   :  { %975 = vrot.lane.b32.xlu1 %v1412_v1, %s1429_s23 }
0x1110   :  { %v1414_v3 = vpop.eup %1413 }
0x1111   :  { %v969_v6 = vadd.f32 1.0, %v1414_v3 }
0x1113   :  { %1415 = vrcp.f32 %v969_v6 }
0x1120   :  { %v1416_v7 = vpop.eup %1415 }
0x1121   :  { %v973_v5 = vmul.f32 %v1416_v7, %v847_v46  ;;  %v726_v46 = vrot.slane %v1614_v23, %v181_v9 }
0x1123   :  { %v733_v49 = vrot.slane %v726_v46, %v181_v9 }
0x1181   :  { %v976_v0 = vpop.permute.xlu1 %975 }
0x1182   :  { %v978_v8 = vmul.f32 %v1416_v7, %v976_v0 }
0x1184   :  { %980 = vrot.lane.b32.xlu0 %v978_v8, %s1430_s24 }
0x11f6   :  { %v981_v10 = vpop.permute.xlu0 %980 }
0x11f7   :  { %v983_v11 = vadd.f32 %v981_v10, %v973_v5 }
0x11f9   :  { %1417 = vtanh.f32 %v983_v11 }
0x1206   :  { %v1418_v13 = vpop.eup %1417 }
0x1207   :  { %986 = vrot.lane.b32.xlu1 %v1418_v13, %s1429_s23 }
0x1279   :  { %v987_v14 = vpop.permute.xlu1 %986 }
0x127a   :  { %v989_v15 = vmul.f32 %v1416_v7, %v987_v14 }
0x127c   :  { %v990_v16 = vpack.c.bf16 %v989_v15, %v989_v15 }
0x127e   :  { %1011 = vrot.lane.b32.xlu0 %v990_v16, %s1430_s24  ;;  %v998_v48 = vrot.slane %v990_v16, %v181_v9 }
0x1280   :  { %v1005_v50 = vrot.slane %v998_v48, %v181_v9 }
0x12f0   :  { %v1012_v21 = vpop.permute.xlu0 %1011 }
0x12f1   :  { %1346 = vmatmul.mubr.msk.bf16.vlgmr.msra.gmra.mxu1 %vm46_vm4, %v1012_v21 }
0x13b1   :  { %v1050_v24 = vpop.f32.mrf.mxu1 }
0x13b2   :  { %v1101_v25 = vadd.f32 %v1096_v22, %v1050_v24 }
0x13b3   :  { %v1347_v26 = vpop.f32.mrf.mxu1 }
0x13b4   :  { %1419 = vtanh.f32 %v1101_v25  ;;  %v1201_v31 = vmul.f32 -1.442695, %v1101_v25 }
0x13b5   :  { %v1053_v27 = vpop.f32.mrf.mxu1 }
0x13b6   :  { %1421 = vpow2.f32 %v1201_v31 }
0x13b7   :  { %v1348_v29 = vpop.f32.mrf.mxu1 }
0x13c1   :  { %v1420_v30 = vpop.eup %1419 }
0x13c2   :  { %1111 = vrot.lane.b32.xlu1 %v1420_v30, %s1429_s23 }
0x13c3   :  { %v1422_v32 = vpop.eup %1421 }
0x13c4   :  { %v1105_v33 = vadd.f32 1.0, %v1422_v32 }
0x13c6   :  { %1423 = vrcp.f32 %v1105_v33 }
0x13d3   :  { %v1424_v40 = vpop.eup %1423 }
0x13d4   :  { %v1109_v35 = vmul.f32 %v1424_v40, %v983_v11 }
0x1434   :  { %v1112_v41 = vpop.permute.xlu1 %1111 }
0x1435   :  { %v1114_v43 = vmul.f32 %v1424_v40, %v1112_v41 }
0x1437   :  { %1116 = vrot.lane.b32.xlu0 %v1114_v43, %s1430_s24 }
0x143b   :  { %190 = vrot.lane.b32.xlu0 %v189_v45, %s1430_s24 }
0x143f   :  { %462 = vrot.lane.b32.xlu0 %v461_v47, %s1430_s24 }
0x1443   :  { %734 = vrot.lane.b32.xlu0 %v733_v49, %s1430_s24 }
0x1447   :  { %1006 = vrot.lane.b32.xlu0 %v1005_v50, %s1430_s24 }
0x14a9   :  { %v1117_v52 = vpop.permute.xlu0 %1116 }
0x14aa   :  { %v1119_v53 = vadd.f32 %v1117_v52, %v1109_v35 }
0x14ac   :  { %1425 = vtanh.f32 %v1119_v53 }
0x14ad   :  { %v191_v28 = vpop.permute.xlu0 %190 }
0x14ae   :  { %194 = vst.msk [vmem:[%s1713_s4] sm:$0x1] %vm193_vm5, %v191_v28 }
0x14b1   :  { %v463_v23 = vpop.permute.xlu0 %462 }
0x14b2   :  { %1177 = vst.msk [vmem:[%s1713_s4 + $0x2] sm:$0x1] %vm193_vm5, %v463_v23 }
0x14b5   :  { %v735_v54 = vpop.permute.xlu0 %734 }
0x14b6   :  { %1187 = vst.msk [vmem:[%s1713_s4 + $0x4] sm:$0x1] %vm193_vm5, %v735_v54 }
0x14b9   :  { %v1426_v57 = vpop.eup %1425  ;;  %v1007_v2 = vpop.permute.xlu0 %1006 }
0x14ba   :  { %1197 = vst.msk [vmem:[%s1713_s4 + $0x6] sm:$0x1] %vm193_vm5, %v1007_v2  ;;  %1122 = vrot.lane.b32.xlu1 %v1426_v57, %s1429_s23  ;;  %s1432_s23 = smov 96  }
0x14be   :  { %326 = vrot.lane.b32.xlu1 %v325_v59, %s1430_s24 }
0x14c2   :  { %598 = vrot.lane.b32.xlu1 %v597_v62, %s1430_s24 }
0x14c6   :  { %870 = vrot.lane.b32.xlu1 %v869_v61, %s1430_s24 }
0x152c   :  { %v1123_v63 = vpop.permute.xlu1 %1122 }
0x152d   :  { %v1125_v1 = vmul.f32 %v1424_v40, %v1123_v63 }
0x152f   :  { %v1126_v4 = vpack.c.bf16 %v1125_v1, %v1125_v1  ;;  %1148 = vrot.lane.b32.xlu0 %v1125_v1, %s1430_s24 }
0x1530   :  { %v327_v3 = vpop.permute.xlu1 %326 }
0x1531   :  { %v1134_v6 = vrot.slane %v1126_v4, %v181_v9  ;;  %1172 = vst.msk [vmem:[%s1713_s4 + $0x1] sm:$0x1] %vm193_vm5, %v327_v3 }
0x1533   :  { %v1141_v55 = vrot.slane %v1134_v6, %v181_v9 }
0x1534   :  { %v599_v51 = vpop.permute.xlu1 %598 }
0x1535   :  { %1182 = vst.msk [vmem:[%s1713_s4 + $0x3] sm:$0x1] %vm193_vm5, %v599_v51  ;;  %1142 = vrot.lane.b32.xlu1 %v1141_v55, %s1430_s24 }
0x1538   :  { %v871_v7 = vpop.permute.xlu1 %870 }
0x1539   :  { %1192 = vst.msk [vmem:[%s1713_s4 + $0x5] sm:$0x1] %vm193_vm5, %v871_v7  ;;  %1154 = vrot.lane.b32.xlu1 %v1119_v53, %s1432_s23 }
0x15a1   :  { %v1149_v0 = vpop.permute.xlu0 %1148 }
0x15a2   :  { %1152 = vst.msk [vmem:[#allocation2] sm:$0x3] %vm22_vm3, %v1149_v0 }
0x15a7   :  { %v1143_v8 = vpop.permute.xlu1 %1142 }
0x15a8   :  { %1202 = vst.msk [vmem:[%s1713_s4 + $0x7] sm:$0x1] %vm193_vm5, %v1143_v8 }
0x15ab   :  { %v1155_v5 = vpop.permute.xlu1 %1154 }
0x15ac   :  { %1157 = vst.msk [vmem:[#allocation3] sm:$0x3] %vm22_vm3, %v1155_v5 }

</bundles_post_ra>
